<compile_context>
chip_gen: v7x
topology: tpu7x:2x2x1
jax: 0.10.0
libtpu: 0.0.40
codegen_flags: <defaults>
</compile_context>

<pallas_src>
import math
from functools import partial

import jax
import jax.numpy as jnp
from jax.experimental import pallas as pl
from jax.experimental.pallas import tpu as pltpu

# ----------------------------------------------------------------------------
# Tiling / compiler knobs
# ----------------------------------------------------------------------------
TILE_M = 512            # row tile when M is large  (multiple of 8)
TILE_N = 512            # col tile when N is large  (multiple of 128)

try:   # generation-aware scoped-VMEM limit (<=48 MiB keeps v7x's 64 MiB happy)
    _VMEM_PHYS = int(pltpu.get_tpu_info().vmem_capacity_bytes)
except Exception:                                   # defensive fallback
    _VMEM_PHYS = 64 * 1024 * 1024
VMEM_LIMIT = min(48 * 1024 * 1024, (3 * _VMEM_PHYS) // 4)

_MOSAIC_2D = pltpu.CompilerParams(
    dimension_semantics=("parallel", "parallel"), vmem_limit_bytes=VMEM_LIMIT)
_MOSAIC_1D = pltpu.CompilerParams(
    dimension_semantics=("parallel",), vmem_limit_bytes=VMEM_LIMIT)


def _round_up(x, m):
    return ((x + m - 1) // m) * m


def _block_dim(dim, tile, align):
    """Return (block, padded_dim).  Full-extent block when dim fits one tile;
    a single ragged block (minimal pad) when dim < 2*tile; else tile-sized."""
    if dim <= tile:
        return dim, dim
    if dim < 2 * tile:
        blk = _round_up(dim, align)
        return blk, blk
    return tile, _round_up(dim, tile)


def _pad2d(x, rows, cols):
    r, c = x.shape
    if (r, c) == (rows, cols):
        return x
    return jnp.pad(x, ((0, rows - r), (0, cols - c)))


def _mm_grid(M, N):
    bm, Mp = _block_dim(M, TILE_M, 8)
    bn, Np = _block_dim(N, TILE_N, 128)
    return bm, Mp, bn, Np


# ----------------------------------------------------------------------------
# Pallas kernels
# ----------------------------------------------------------------------------
def _norm_mm_kernel(x_ref, nw_ref, w_ref, o_ref, *, eps):
    # y = rmsnorm(x) @ W   (norm in f32 on the VPU, dot in bf16 on the MXU)
    x = x_ref[...].astype(jnp.float32)
    ms = jnp.mean(x * x, axis=-1, keepdims=True)
    xn = (x * jax.lax.rsqrt(ms + eps) * nw_ref[...]).astype(jnp.bfloat16)
    y = jnp.dot(xn, w_ref[...], preferred_element_type=jnp.float32)
    o_ref[...] = y.astype(o_ref.dtype)


def _mm_res_kernel(a_ref, w_ref, r_ref, o_ref):
    # y = residual + a @ W   (residual add fused into the matmul epilogue)
    y = jnp.dot(a_ref[...], w_ref[...], preferred_element_type=jnp.float32)
    o_ref[...] = (y + r_ref[...]).astype(o_ref.dtype)


def _mm_kernel(a_ref, w_ref, o_ref):
    y = jnp.dot(a_ref[...], w_ref[...], preferred_element_type=jnp.float32)
    o_ref[...] = y.astype(o_ref.dtype)


def _norm_ffn_kernel(x_ref, nw_ref, w1_ref, w3_ref, o_ref, *, eps):
    # gu = SiLU(rmsnorm(x) @ w1) * (rmsnorm(x) @ w3), fully fused in VMEM.
    x = x_ref[...].astype(jnp.float32)
    ms = jnp.mean(x * x, axis=-1, keepdims=True)
    xn = (x * jax.lax.rsqrt(ms + eps) * nw_ref[...]).astype(jnp.bfloat16)
    g = jnp.dot(xn, w1_ref[...], preferred_element_type=jnp.float32)
    u = jnp.dot(xn, w3_ref[...], preferred_element_type=jnp.float32)
    sig = 0.5 * (jnp.tanh(0.5 * g) + 1.0)      # exact sigmoid, single EUP op
    o_ref[...] = (g * sig * u).astype(o_ref.dtype)


def _rmsnorm_kernel(x_ref, w_ref, o_ref, *, eps):
    x = x_ref[...].astype(jnp.float32)
    ms = jnp.mean(x * x, axis=-1, keepdims=True)
    o_ref[...] = (x * jax.lax.rsqrt(ms + eps) * w_ref[...]).astype(o_ref.dtype)


def _attn_kernel(q_ref, k_ref, v_ref, b_ref, o_ref, *, scale):
    # Head-batched attention: one batch element per grid step, all heads via
    # batched dot_generals (no per-head lane slices / concatenates).
    q = q_ref[0]                                             # (nh, S, hd) bf16
    k = k_ref[0]
    v = v_ref[0]
    s = jax.lax.dot_general(q, k, (((2,), (2,)), ((0,), (0,))),
                            preferred_element_type=jnp.float32)   # (nh, S, S)
    s = s * scale + b_ref[...][None, :, :]
    m = jnp.max(s, axis=-1, keepdims=True)
    p = jnp.exp(s - m)
    p = p / jnp.sum(p, axis=-1, keepdims=True)               # exact softmax
    o = jax.lax.dot_general(p.astype(v.dtype), v,
                            (((2,), (1,)), ((0,), (0,))),
                            preferred_element_type=jnp.float32)   # (nh, S, hd)
    o_ref[0] = o.astype(o_ref.dtype)


# ----------------------------------------------------------------------------
# Kernel wrappers
# ----------------------------------------------------------------------------
def norm_matmul(x2d, norm_w, w, eps, out_dtype=jnp.bfloat16):
    """rmsnorm(x) @ w.  x: (M, D), w: (D, N) bf16.  D kept resident."""
    M, D = x2d.shape
    D2, N = w.shape
    assert D == D2
    bm, Mp, bn, Np = _mm_grid(M, N)
    x_p = _pad2d(x2d, Mp, D)
    w_p = _pad2d(w, D, Np)
    out = pl.pallas_call(
        partial(_norm_mm_kernel, eps=eps),
        grid=(Mp // bm, Np // bn),
        in_specs=[pl.BlockSpec((bm, D), lambda i, j: (i, 0)),
                  pl.BlockSpec((1, D), lambda i, j: (0, 0)),
                  pl.BlockSpec((D, bn), lambda i, j: (0, j))],
        out_specs=pl.BlockSpec((bm, bn), lambda i, j: (i, j)),
        out_shape=jax.ShapeDtypeStruct((Mp, Np), out_dtype),
        compiler_params=_MOSAIC_2D,
    )(x_p, norm_w.reshape(1, D), w_p)
    return out[:M, :N] if (Mp, Np) != (M, N) else out


def matmul_residual(a, w, res):
    """res + a @ w.  a: (M, K) bf16, w: (K, N) bf16, res: (M, N) f32 -> f32."""
    M, K = a.shape
    K2, N = w.shape
    assert K == K2 and res.shape == (M, N)
    bm, Mp, bn, Np = _mm_grid(M, N)
    a_p = _pad2d(a.astype(jnp.bfloat16), Mp, K)
    w_p = _pad2d(w, K, Np)
    r_p = _pad2d(res, Mp, Np)
    out = pl.pallas_call(
        _mm_res_kernel,
        grid=(Mp // bm, Np // bn),
        in_specs=[pl.BlockSpec((bm, K), lambda i, j: (i, 0)),
                  pl.BlockSpec((K, bn), lambda i, j: (0, j)),
                  pl.BlockSpec((bm, bn), lambda i, j: (i, j))],
        out_specs=pl.BlockSpec((bm, bn), lambda i, j: (i, j)),
        out_shape=jax.ShapeDtypeStruct((Mp, Np), jnp.float32),
        compiler_params=_MOSAIC_2D,
    )(a_p, w_p, r_p)
    return out[:M, :N] if (Mp, Np) != (M, N) else out


def matmul(a, w, out_dtype=jnp.float32):
    """Plain a @ w (a cast to bf16, f32 accumulate)."""
    M, K = a.shape
    K2, N = w.shape
    assert K == K2
    bm, Mp, bn, Np = _mm_grid(M, N)
    a_p = _pad2d(a.astype(jnp.bfloat16), Mp, K)
    w_p = _pad2d(w, K, Np)
    out = pl.pallas_call(
        _mm_kernel,
        grid=(Mp // bm, Np // bn),
        in_specs=[pl.BlockSpec((bm, K), lambda i, j: (i, 0)),
                  pl.BlockSpec((K, bn), lambda i, j: (0, j))],
        out_specs=pl.BlockSpec((bm, bn), lambda i, j: (i, j)),
        out_shape=jax.ShapeDtypeStruct((Mp, Np), out_dtype),
        compiler_params=_MOSAIC_2D,
    )(a_p, w_p)
    return out[:M, :N] if (Mp, Np) != (M, N) else out


def norm_ffn_swiglu(h2d, norm_w, w1, w3, eps):
    """SiLU(rmsnorm(h) @ w1) * (rmsnorm(h) @ w3) -> (M, inter) bf16."""
    M, D = h2d.shape
    D2, I = w1.shape
    assert D == D2 and w3.shape == (D, I)
    bm, Mp, bn, Np = _mm_grid(M, I)
    h_p = _pad2d(h2d, Mp, D)
    w1_p = _pad2d(w1, D, Np)
    w3_p = _pad2d(w3, D, Np)
    out = pl.pallas_call(
        partial(_norm_ffn_kernel, eps=eps),
        grid=(Mp // bm, Np // bn),
        in_specs=[pl.BlockSpec((bm, D), lambda i, j: (i, 0)),
                  pl.BlockSpec((1, D), lambda i, j: (0, 0)),
                  pl.BlockSpec((D, bn), lambda i, j: (0, j)),
                  pl.BlockSpec((D, bn), lambda i, j: (0, j))],
        out_specs=pl.BlockSpec((bm, bn), lambda i, j: (i, j)),
        out_shape=jax.ShapeDtypeStruct((Mp, Np), jnp.bfloat16),
        compiler_params=_MOSAIC_2D,
    )(h_p, norm_w.reshape(1, D), w1_p, w3_p)
    return out[:M, :I] if (Mp, Np) != (M, I) else out


def rmsnorm2d(x2d, w, eps, out_dtype=jnp.bfloat16, tr=1024):
    T, D = x2d.shape
    bt, Tp = _block_dim(T, tr, 8)
    x_p = _pad2d(x2d, Tp, D)
    out = pl.pallas_call(
        partial(_rmsnorm_kernel, eps=eps),
        grid=(Tp // bt,),
        in_specs=[pl.BlockSpec((bt, D), lambda i: (i, 0)),
                  pl.BlockSpec((1, D), lambda i: (0, 0))],
        out_specs=pl.BlockSpec((bt, D), lambda i: (i, 0)),
        out_shape=jax.ShapeDtypeStruct((Tp, D), out_dtype),
        compiler_params=_MOSAIC_1D,
    )(x_p, w.reshape(1, D))
    return out[:T] if Tp != T else out


def pallas_attention(q, k, v, bias, scale):
    """q, k, v: (B, nh, S, hd) bf16; bias: (S, S) f32 additive mask."""
    B, nh, S, hd = q.shape
    return pl.pallas_call(
        partial(_attn_kernel, scale=scale),
        grid=(B,),
        in_specs=[pl.BlockSpec((1, nh, S, hd), lambda i: (i, 0, 0, 0)),
                  pl.BlockSpec((1, nh, S, hd), lambda i: (i, 0, 0, 0)),
                  pl.BlockSpec((1, nh, S, hd), lambda i: (i, 0, 0, 0)),
                  pl.BlockSpec((S, S), lambda i: (0, 0))],
        out_specs=pl.BlockSpec((1, nh, S, hd), lambda i: (i, 0, 0, 0)),
        out_shape=jax.ShapeDtypeStruct((B, nh, S, hd), jnp.bfloat16),
        compiler_params=_MOSAIC_1D,
    )(q, k, v, bias)


# ----------------------------------------------------------------------------
# Model glue (plain JAX): embedding gathers, RoPE, mask / rope-cache build
# ----------------------------------------------------------------------------
def build_rope_cache(seq_len, n_elem, base):
    theta = 1.0 / (base ** (jnp.arange(0, n_elem, 2, dtype=jnp.float32) / n_elem))
    seq = jnp.arange(seq_len, dtype=jnp.float32)
    idx_theta = jnp.outer(seq, theta)
    idx_theta = jnp.concatenate([idx_theta, idx_theta], axis=-1)
    return jnp.cos(idx_theta), jnp.sin(idx_theta)


def apply_rope(x, cos, sin, n_elem):
    # x: (b, s, nh, hd) bf16; rotation math in f32, result cast back to bf16.
    xf = x.astype(jnp.float32)
    x_rope, x_pass = xf[..., :n_elem], xf[..., n_elem:]
    x1, x2 = x_rope[..., : n_elem // 2], x_rope[..., n_elem // 2:]
    rotated = jnp.concatenate([-x2, x1], axis=-1)
    x_rope = x_rope * cos[None, :, None, :] + rotated * sin[None, :, None, :]
    return jnp.concatenate([x_rope, x_pass], axis=-1).astype(jnp.bfloat16)


def mha(x2d, p, cos, sin, bias, cfg, b, s):
    nh, hd = cfg["n_head"], cfg["head_dim"]
    eps = cfg["norm_eps"]
    # fused RMSNorm + QKV projection (bf16 out)
    qkv = norm_matmul(x2d, p["attn_norm"], p["wqkv"], eps,
                      out_dtype=jnp.bfloat16)
    q, k, v = jnp.split(qkv, 3, axis=-1)
    q = apply_rope(q.reshape(b, s, nh, hd), cos, sin, cfg["rope_n_elem"])
    k = apply_rope(k.reshape(b, s, nh, hd), cos, sin, cfg["rope_n_elem"])
    v = v.reshape(b, s, nh, hd)
    q = q.transpose(0, 2, 1, 3)                     # (b, nh, s, hd)
    k = k.transpose(0, 2, 1, 3)
    v = v.transpose(0, 2, 1, 3)
    o = pallas_attention(q, k, v, bias, 1.0 / math.sqrt(hd))
    o = o.transpose(0, 2, 1, 3).reshape(b * s, nh * hd)
    # fused wo projection + residual add
    return matmul_residual(o, p["wo"], x2d)


def transformer_block(x, p, cos, sin, bias, cfg):
    b, s, d = x.shape
    x2d = x.reshape(b * s, d)
    h2d = mha(x2d, p, cos, sin, bias, cfg, b, s)             # includes +x
    gu = norm_ffn_swiglu(h2d, p["ffn_norm"], p["w1"], p["w3"], cfg["norm_eps"])
    out2d = matmul_residual(gu, p["w2"], h2d)                # includes +h
    return out2d.reshape(b, s, d)


def cat_mask_bias(cfg):
    """Additive bias realizing get_cat_mask(1 + chunk_size)."""
    block = 1 + cfg["chunk_size"]
    S = cfg["num_chunks"] * block + 1
    q_idx = jnp.arange(S)[:, None]
    kv_idx = jnp.arange(S)[None, :]
    within_block = (q_idx // block) == (kv_idx // block)
    divides_block = (kv_idx % block) == 0
    causal = q_idx >= kv_idx
    allowed = (divides_block | within_block) & causal
    return jnp.where(allowed, 0.0, -1e30).astype(jnp.float32)


def cat_rope_cache(cfg):
    """Replicates CAT_Transformer.setup_cache position layout."""
    K, cs, ne, base = (cfg["num_chunks"], cfg["chunk_size"],
                       cfg["rope_n_elem"], cfg["rope_base"])
    _cos, _sin = build_rope_cache(K + cs, ne, base)          # (K+cs, ne)
    cos_rows = [_cos[i:i + 1 + cs] for i in range(K)]
    sin_rows = [_sin[i:i + 1 + cs] for i in range(K)]
    cos = jnp.concatenate(cos_rows + [_cos[K:K + 1]], axis=0)
    sin = jnp.concatenate(sin_rows + [_sin[K:K + 1]], axis=0)
    return cos, sin                                          # (K*(1+cs)+1, ne)


def compress_all_chunks(ids3, fparams, cfg):
    """Equivalent of torch.vmap(self.f.compress, in_dims=(1, 0), out_dims=1)."""
    b, K, cs = ids3.shape
    d = cfg["dim"]
    flat = ids3.reshape(b * K, cs)
    x = fparams["wte"][flat]                                 # (b*K, cs, d)
    chunk_idx = jnp.tile(jnp.arange(K), b)                   # chunk id per row
    pos = fparams["pos_tokens"][chunk_idx][:, None, :]       # (b*K, 1, d)
    x = jnp.concatenate([pos, x], axis=1)                    # (b*K, 1+cs, d)

    cos, sin = build_rope_cache(1 + cs, cfg["rope_n_elem"], cfg["rope_base"])
    bias = jnp.zeros((1 + cs, 1 + cs), jnp.float32)          # non-causal
    for lp in fparams["layers"]:
        x = transformer_block(x, lp, cos, sin, bias, cfg)
    # Final norm commutes with dropping the pos-token row, so gather first,
    # normalize, then project.
    x = x[:, 1:, :].reshape(b * K * cs, d)
    xn = rmsnorm2d(x, fparams["norm"], cfg["norm_eps"], out_dtype=jnp.bfloat16)
    fx = matmul(xn.reshape(b * K, cs * d), fparams["proj_fx"])   # (b*K, dim_fx)
    return fx.reshape(b, K, -1)


def cat_forward(input_ids, params, cfg):
    b, seqlen = input_ids.shape
    cs = cfg["chunk_size"]
    K = seqlen // cs
    d = cfg["dim"]
    ids3 = input_ids.reshape(b, K, cs)

    fx = compress_all_chunks(ids3, params["f"], cfg)         # (b, K, dim_fx)
    # dim_fx == dim  ->  down_proj is nn.Identity()
    fx_last = fx[:, -1:, :]                                  # (b, 1, d)
    dummy = jnp.broadcast_to(params["dummy_fx"][0][None, None, :], (b, 1, d))
    fx_shift = jnp.concatenate([dummy, fx[:, :-1, :]], axis=1)    # (b, K, d)

    emb = params["wte"][ids3]                                # (b, K, cs, d)
    x = jnp.concatenate([fx_shift[:, :, None, :], emb], axis=2)   # (b, K, 1+cs, d)
    x = x.reshape(b, K * (1 + cs), d)
    x = jnp.concatenate([x, fx_last], axis=1)                # (b, S, d)

    cos, sin = cat_rope_cache(cfg)
    bias = cat_mask_bias(cfg)
    for lp in params["layers"]:
        x = transformer_block(x, lp, cos, sin, bias, cfg)

    # Final RMSNorm commutes with the row gather below, so gather the logits
    # rows first and fuse the norm into the vocab projection.
    x_last = x[:, -1:, :]
    xb = x[:, :-1, :].reshape(b, K, 1 + cs, d)
    x_first = xb[:, 0, 1:-1, :]                              # (b, cs-1, d)
    x_middle = xb[:, 1:, :-1, :].reshape(b, (K - 1) * cs, d)
    xg = jnp.concatenate([x_first, x_middle, x_last], axis=1)     # (b, K*cs, d)
    logits = norm_matmul(xg.reshape(b * seqlen, d), params["norm"],
                         params["output"], cfg["norm_eps"],
                         out_dtype=jnp.float32)
    return logits.reshape(b, seqlen, -1)                     # (b, seqlen, vocab)


# ----------------------------------------------------------------------------
# Deterministic parameter construction (matmul weights stored bf16 once)
# ----------------------------------------------------------------------------
def _normal(key, shape, std=0.02, dtype=jnp.float32):
    return (std * jax.random.normal(key, shape, jnp.float32)).astype(dtype)


def init_block(key, cfg):
    d, nh, hd, inter = cfg["dim"], cfg["n_head"], cfg["head_dim"], cfg["inter"]
    ks = jax.random.split(key, 5)
    bf = jnp.bfloat16
    return dict(
        attn_norm=jnp.ones((d,), jnp.float32),
        wqkv=_normal(ks[0], (d, 3 * nh * hd), dtype=bf),
        wo=_normal(ks[1], (d, d), dtype=bf),
        ffn_norm=jnp.ones((d,), jnp.float32),
        w1=_normal(ks[2], (d, inter), dtype=bf),
        w3=_normal(ks[3], (d, inter), dtype=bf),
        w2=_normal(ks[4], (inter, d), dtype=bf),
    )


def init_params(key, cfg):
    d, V, cs, K = cfg["dim"], cfg["vocab"], cfg["chunk_size"], cfg["num_chunks"]
    bf = jnp.bfloat16
    keys = jax.random.split(key, 8 + 2 * cfg["n_layer"])
    f_layers = [init_block(keys[4 + i], cfg) for i in range(cfg["n_layer"])]
    m_layers = [init_block(keys[4 + cfg["n_layer"] + i], cfg)
                for i in range(cfg["n_layer"])]
    fparams = dict(
        wte=_normal(keys[0], (V, d)),
        pos_tokens=_normal(keys[1], (K, d)),
        layers=f_layers,
        norm=jnp.ones((d,), jnp.float32),
        proj_fx=_normal(keys[2], (d * cs, d), dtype=bf),     # dim_fx == dim
    )
    return dict(
        f=fparams,
        dummy_fx=_normal(keys[3], (1, d)),
        wte=_normal(keys[-4], (V, d)),
        layers=m_layers,
        norm=jnp.ones((d,), jnp.float32),
        output=_normal(keys[-3], (d, V), dtype=bf),
    )


# ----------------------------------------------------------------------------
if __name__ == "__main__":
    cfg = dict(
        dim=32, n_head=4, head_dim=8, n_layer=2, inter=64,
        vocab=64, chunk_size=4, num_chunks=2,                # block_size = 8
        rope_n_elem=8, rope_base=10000.0, norm_eps=1e-5,
    )
    batch, seqlen = 2, cfg["chunk_size"] * cfg["num_chunks"]     # (2, 8)

    key = jax.random.PRNGKey(0)
    k_param, k_data = jax.random.split(key)
    params = init_params(k_param, cfg)
    input_ids = jax.random.randint(k_data, (batch, seqlen), 0, cfg["vocab"],
                                   dtype=jnp.int32)

    fwd = jax.jit(lambda ids, p: cat_forward(ids, p, cfg))
    logits = fwd(input_ids, params)
    logits = jax.block_until_ready(logits)

    assert logits.shape == (batch, seqlen, cfg["vocab"]), logits.shape
    assert bool(jnp.isfinite(logits).all())
    print("KERNEL_OK")
</pallas_src>

<mosaic_0001>
module attributes {stable_mosaic.version = 11 : i64} {
  func.func @_norm_mm_kernel(%arg0: i32, %arg1: i32, %arg2: memref<20x32xf32, #tpu.memory_space<vmem>>, %arg3: memref<1x32xf32, #tpu.memory_space<vmem>>, %arg4: memref<32x96xbf16, #tpu.memory_space<vmem>>, %arg5: memref<20x96xbf16, #tpu.memory_space<vmem>>) attributes {dimension_semantics = [#tpu.dimension_semantics<parallel>, #tpu.dimension_semantics<parallel>], iteration_bounds = array<i64: 1, 1>, scalar_prefetch = 0 : i64, scratch_operands = 0 : i64, tpu.core_type = #tpu.core_type<tc>, window_params = [{transform_indices = @transform_0, window_bounds = array<i64: 20, 32>}, {pipeline_mode = #tpu.pipeline_mode<synchronous>, transform_indices = @transform_1, window_bounds = array<i64: 1, 32>}, {transform_indices = @transform_2, window_bounds = array<i64: 32, 96>}, {transform_indices = @transform_3, window_bounds = array<i64: 20, 96>}]} {
    %c0 = arith.constant 0 : index
    %c0_0 = arith.constant 0 : index
    %0 = vector.load %arg2[%c0, %c0_0] : memref<20x32xf32, #tpu.memory_space<vmem>>, vector<20x32xf32>
    %1 = arith.mulf %0, %0 : vector<20x32xf32>
    %cst = arith.constant dense<0.000000e+00> : vector<20xf32>
    %2 = vector.multi_reduction <add>, %1, %cst [1] : vector<20x32xf32> to vector<20xf32>
    %3 = vector.shape_cast %2 : vector<20xf32> to vector<20x1xf32>
    %cst_1 = arith.constant 3.200000e+01 : f32
    %4 = vector.broadcast %cst_1 : f32 to vector<20x1xf32>
    %5 = arith.divf %3, %4 : vector<20x1xf32>
    %cst_2 = arith.constant 9.99999974E-6 : f32
    %6 = vector.broadcast %cst_2 : f32 to vector<20x1xf32>
    %7 = arith.addf %5, %6 : vector<20x1xf32>
    %8 = math.rsqrt %7 : vector<20x1xf32>
    %9 = vector.broadcast %8 : vector<20x1xf32> to vector<20x32xf32>
    %10 = arith.mulf %0, %9 : vector<20x32xf32>
    %c0_3 = arith.constant 0 : index
    %c0_4 = arith.constant 0 : index
    %11 = vector.load %arg3[%c0_3, %c0_4] : memref<1x32xf32, #tpu.memory_space<vmem>>, vector<1x32xf32>
    %12 = vector.broadcast %11 : vector<1x32xf32> to vector<20x32xf32>
    %13 = arith.mulf %10, %12 : vector<20x32xf32>
    %14 = arith.truncf %13 : vector<20x32xf32> to vector<20x32xbf16>
    %c0_5 = arith.constant 0 : index
    %c0_6 = arith.constant 0 : index
    %15 = vector.load %arg4[%c0_5, %c0_6] : memref<32x96xbf16, #tpu.memory_space<vmem>>, vector<32x96xbf16>
    %cst_7 = arith.constant dense<0.000000e+00> : vector<20x96xf32>
    %16 = tpu.matmul %14, %15, %cst_7 {dimension_numbers = #tpu.dot_dimension_numbers<[1], [0], [0], [1], [0, 0, 1, 1], [], []>} : vector<20x32xbf16>, vector<32x96xbf16>, vector<20x96xf32> -> vector<20x96xf32>
    %17 = arith.truncf %16 : vector<20x96xf32> to vector<20x96xbf16>
    %c0_8 = arith.constant 0 : index
    %c0_9 = arith.constant 0 : index
    %18 = vector.load %arg5[%c0_8, %c0_9] : memref<20x96xbf16, #tpu.memory_space<vmem>>, vector<20x96xbf16>
    tpu.vector_store %arg5[%c0_8, %c0_9], %17 {strides = array<i32>} : memref<20x96xbf16, #tpu.memory_space<vmem>>, vector<20x96xbf16>,
    return
  }
  func.func @transform_0(%arg0: i32, %arg1: i32) -> (i32, i32) {
    %c0_i32 = arith.constant 0 : i32
    %c0_i32_0 = arith.constant 0 : i32
    return %arg0, %c0_i32 : i32, i32
  }
  func.func @transform_1(%arg0: i32, %arg1: i32) -> (i32, i32) {
    %c0_i32 = arith.constant 0 : i32
    %c0_i32_0 = arith.constant 0 : i32
    %c0_i32_1 = arith.constant 0 : i32
    return %c0_i32, %c0_i32_0 : i32, i32
  }
  func.func @transform_2(%arg0: i32, %arg1: i32) -> (i32, i32) {
    %c0_i32 = arith.constant 0 : i32
    %c0_i32_0 = arith.constant 0 : i32
    return %c0_i32, %arg1 : i32, i32
  }
  func.func @transform_3(%arg0: i32, %arg1: i32) -> (i32, i32) {
    %c0_i32 = arith.constant 0 : i32
    return %arg0, %arg1 : i32, i32
  }
}

module attributes {stable_mosaic.version = 11 : i64} {
  func.func @_attn_kernel(%arg0: i32, %arg1: memref<1x4x5x8xbf16, #tpu.memory_space<vmem>>, %arg2: memref<1x4x5x8xbf16, #tpu.memory_space<vmem>>, %arg3: memref<1x4x5x8xbf16, #tpu.memory_space<vmem>>, %arg4: memref<5x5xf32, #tpu.memory_space<vmem>>, %arg5: memref<1x4x5x8xbf16, #tpu.memory_space<vmem>>) attributes {dimension_semantics = [#tpu.dimension_semantics<parallel>], iteration_bounds = array<i64: 4>, scalar_prefetch = 0 : i64, scratch_operands = 0 : i64, tpu.core_type = #tpu.core_type<tc>, window_params = [{transform_indices = @transform_0, window_bounds = array<i64: 1, 4, 5, 8>}, {transform_indices = @transform_1, window_bounds = array<i64: 1, 4, 5, 8>}, {transform_indices = @transform_2, window_bounds = array<i64: 1, 4, 5, 8>}, {pipeline_mode = #tpu.pipeline_mode<synchronous>, transform_indices = @transform_3, window_bounds = array<i64: 5, 5>}, {transform_indices = @transform_4, window_bounds = array<i64: 1, 4, 5, 8>}]} {
    %c0 = arith.constant 0 : index
    %c0_0 = arith.constant 0 : index
    %c0_1 = arith.constant 0 : index
    %c0_2 = arith.constant 0 : index
    %0 = vector.load %arg1[%c0, %c0_0, %c0_1, %c0_2] : memref<1x4x5x8xbf16, #tpu.memory_space<vmem>>, vector<1x4x5x8xbf16>
    %1 = vector.shape_cast %0 : vector<1x4x5x8xbf16> to vector<4x5x8xbf16>
    %c0_3 = arith.constant 0 : index
    %c0_4 = arith.constant 0 : index
    %c0_5 = arith.constant 0 : index
    %c0_6 = arith.constant 0 : index
    %2 = vector.load %arg2[%c0_3, %c0_4, %c0_5, %c0_6] : memref<1x4x5x8xbf16, #tpu.memory_space<vmem>>, vector<1x4x5x8xbf16>
    %3 = vector.shape_cast %2 : vector<1x4x5x8xbf16> to vector<4x5x8xbf16>
    %c0_7 = arith.constant 0 : index
    %c0_8 = arith.constant 0 : index
    %c0_9 = arith.constant 0 : index
    %c0_10 = arith.constant 0 : index
    %4 = vector.load %arg3[%c0_7, %c0_8, %c0_9, %c0_10] : memref<1x4x5x8xbf16, #tpu.memory_space<vmem>>, vector<1x4x5x8xbf16>
    %5 = vector.shape_cast %4 : vector<1x4x5x8xbf16> to vector<4x5x8xbf16>
    %cst = arith.constant dense<0.000000e+00> : vector<4x5x5xf32>
    %6 = tpu.matmul %1, %3, %cst {dimension_numbers = #tpu.dot_dimension_numbers<[2], [2], [1], [1], [0, 0, 0, 1, 1, 1], [0], [0]>} : vector<4x5x8xbf16>, vector<4x5x8xbf16>, vector<4x5x5xf32> -> vector<4x5x5xf32>
    %cst_11 = arith.constant 0.353553385 : f32
    %7 = vector.broadcast %cst_11 : f32 to vector<4x5x5xf32>
    %8 = arith.mulf %6, %7 : vector<4x5x5xf32>
    %c0_12 = arith.constant 0 : index
    %c0_13 = arith.constant 0 : index
    %9 = vector.load %arg4[%c0_12, %c0_13] : memref<5x5xf32, #tpu.memory_space<vmem>>, vector<5x5xf32>
    %10 = vector.shape_cast %9 : vector<5x5xf32> to vector<1x5x5xf32>
    %11 = vector.broadcast %10 : vector<1x5x5xf32> to vector<4x5x5xf32>
    %12 = arith.addf %8, %11 : vector<4x5x5xf32>
    %cst_14 = arith.constant dense<0xFF800000> : vector<4x5xf32>
    %13 = vector.multi_reduction <maximumf>, %12, %cst_14 [2] : vector<4x5x5xf32> to vector<4x5xf32>
    %14 = vector.shape_cast %13 : vector<4x5xf32> to vector<4x5x1xf32>
    %15 = vector.broadcast %14 : vector<4x5x1xf32> to vector<4x5x5xf32>
    %16 = arith.subf %12, %15 : vector<4x5x5xf32>
    %17 = math.exp %16 : vector<4x5x5xf32>
    %cst_15 = arith.constant dense<0.000000e+00> : vector<4x5xf32>
    %18 = vector.multi_reduction <add>, %17, %cst_15 [2] : vector<4x5x5xf32> to vector<4x5xf32>
    %19 = vector.shape_cast %18 : vector<4x5xf32> to vector<4x5x1xf32>
    %20 = vector.broadcast %19 : vector<4x5x1xf32> to vector<4x5x5xf32>
    %21 = arith.divf %17, %20 : vector<4x5x5xf32>
    %22 = arith.truncf %21 : vector<4x5x5xf32> to vector<4x5x5xbf16>
    %cst_16 = arith.constant dense<0.000000e+00> : vector<4x5x8xf32>
    %23 = tpu.matmul %22, %5, %cst_16 {dimension_numbers = #tpu.dot_dimension_numbers<[2], [1], [1], [2], [0, 0, 0, 1, 1, 2], [0], [0]>} : vector<4x5x5xbf16>, vector<4x5x8xbf16>, vector<4x5x8xf32> -> vector<4x5x8xf32>
    %24 = arith.truncf %23 : vector<4x5x8xf32> to vector<4x5x8xbf16>
    %c0_17 = arith.constant 0 : index
    %c0_18 = arith.constant 0 : index
    %c0_19 = arith.constant 0 : index
    %c0_20 = arith.constant 0 : index
    %25 = vector.load %arg5[%c0_17, %c0_18, %c0_19, %c0_20] : memref<1x4x5x8xbf16, #tpu.memory_space<vmem>>, vector<1x4x5x8xbf16>
    %26 = vector.shape_cast %25 : vector<1x4x5x8xbf16> to vector<4x5x8xbf16>
    %27 = vector.shape_cast %24 : vector<4x5x8xbf16> to vector<1x4x5x8xbf16>
    tpu.vector_store %arg5[%c0_17, %c0_18, %c0_19, %c0_20], %27 {strides = array<i32>} : memref<1x4x5x8xbf16, #tpu.memory_space<vmem>>, vector<1x4x5x8xbf16>,
    return
  }
  func.func @transform_0(%arg0: i32) -> (i32, i32, i32, i32) {
    %c0_i32 = arith.constant 0 : i32
    %c0_i32_0 = arith.constant 0 : i32
    %c0_i32_1 = arith.constant 0 : i32
    %c0_i32_2 = arith.constant 0 : i32
    return %arg0, %c0_i32, %c0_i32_0, %c0_i32_1 : i32, i32, i32, i32
  }
  func.func @transform_1(%arg0: i32) -> (i32, i32, i32, i32) {
    %c0_i32 = arith.constant 0 : i32
    %c0_i32_0 = arith.constant 0 : i32
    %c0_i32_1 = arith.constant 0 : i32
    %c0_i32_2 = arith.constant 0 : i32
    return %arg0, %c0_i32, %c0_i32_0, %c0_i32_1 : i32, i32, i32, i32
  }
  func.func @transform_2(%arg0: i32) -> (i32, i32, i32, i32) {
    %c0_i32 = arith.constant 0 : i32
    %c0_i32_0 = arith.constant 0 : i32
    %c0_i32_1 = arith.constant 0 : i32
    %c0_i32_2 = arith.constant 0 : i32
    return %arg0, %c0_i32, %c0_i32_0, %c0_i32_1 : i32, i32, i32, i32
  }
  func.func @transform_3(%arg0: i32) -> (i32, i32) {
    %c0_i32 = arith.constant 0 : i32
    %c0_i32_0 = arith.constant 0 : i32
    %c0_i32_1 = arith.constant 0 : i32
    return %c0_i32, %c0_i32_0 : i32, i32
  }
  func.func @transform_4(%arg0: i32) -> (i32, i32, i32, i32) {
    %c0_i32 = arith.constant 0 : i32
    %c0_i32_0 = arith.constant 0 : i32
    %c0_i32_1 = arith.constant 0 : i32
    %c0_i32_2 = arith.constant 0 : i32
    return %arg0, %c0_i32, %c0_i32_0, %c0_i32_1 : i32, i32, i32, i32
  }
}

module attributes {stable_mosaic.version = 11 : i64} {
  func.func @_mm_res_kernel(%arg0: i32, %arg1: i32, %arg2: memref<20x32xbf16, #tpu.memory_space<vmem>>, %arg3: memref<32x32xbf16, #tpu.memory_space<vmem>>, %arg4: memref<20x32xf32, #tpu.memory_space<vmem>>, %arg5: memref<20x32xf32, #tpu.memory_space<vmem>>) attributes {dimension_semantics = [#tpu.dimension_semantics<parallel>, #tpu.dimension_semantics<parallel>], iteration_bounds = array<i64: 1, 1>, scalar_prefetch = 0 : i64, scratch_operands = 0 : i64, tpu.core_type = #tpu.core_type<tc>, window_params = [{transform_indices = @transform_0, window_bounds = array<i64: 20, 32>}, {transform_indices = @transform_1, window_bounds = array<i64: 32, 32>}, {transform_indices = @transform_2, window_bounds = array<i64: 20, 32>}, {transform_indices = @transform_3, window_bounds = array<i64: 20, 32>}]} {
    %c0 = arith.constant 0 : index
    %c0_0 = arith.constant 0 : index
    %0 = vector.load %arg2[%c0, %c0_0] : memref<20x32xbf16, #tpu.memory_space<vmem>>, vector<20x32xbf16>
    %c0_1 = arith.constant 0 : index
    %c0_2 = arith.constant 0 : index
    %1 = vector.load %arg3[%c0_1, %c0_2] : memref<32x32xbf16, #tpu.memory_space<vmem>>, vector<32x32xbf16>
    %cst = arith.constant dense<0.000000e+00> : vector<20x32xf32>
    %2 = tpu.matmul %0, %1, %cst {dimension_numbers = #tpu.dot_dimension_numbers<[1], [0], [0], [1], [0, 0, 1, 1], [], []>} : vector<20x32xbf16>, vector<32x32xbf16>, vector<20x32xf32> -> vector<20x32xf32>
    %c0_3 = arith.constant 0 : index
    %c0_4 = arith.constant 0 : index
    %3 = vector.load %arg4[%c0_3, %c0_4] : memref<20x32xf32, #tpu.memory_space<vmem>>, vector<20x32xf32>
    %4 = arith.addf %2, %3 : vector<20x32xf32>
    %c0_5 = arith.constant 0 : index
    %c0_6 = arith.constant 0 : index
    %5 = vector.load %arg5[%c0_5, %c0_6] : memref<20x32xf32, #tpu.memory_space<vmem>>, vector<20x32xf32>
    tpu.vector_store %arg5[%c0_5, %c0_6], %4 {strides = array<i32>} : memref<20x32xf32, #tpu.memory_space<vmem>>, vector<20x32xf32>,
    return
  }
  func.func @transform_0(%arg0: i32, %arg1: i32) -> (i32, i32) {
    %c0_i32 = arith.constant 0 : i32
    %c0_i32_0 = arith.constant 0 : i32
    return %arg0, %c0_i32 : i32, i32
  }
  func.func @transform_1(%arg0: i32, %arg1: i32) -> (i32, i32) {
    %c0_i32 = arith.constant 0 : i32
    %c0_i32_0 = arith.constant 0 : i32
    return %c0_i32, %arg1 : i32, i32
  }
  func.func @transform_2(%arg0: i32, %arg1: i32) -> (i32, i32) {
    %c0_i32 = arith.constant 0 : i32
    return %arg0, %arg1 : i32, i32
  }
  func.func @transform_3(%arg0: i32, %arg1: i32) -> (i32, i32) {
    %c0_i32 = arith.constant 0 : i32
    return %arg0, %arg1 : i32, i32
  }
}

module attributes {stable_mosaic.version = 11 : i64} {
  func.func @_norm_ffn_kernel(%arg0: i32, %arg1: i32, %arg2: memref<20x32xf32, #tpu.memory_space<vmem>>, %arg3: memref<1x32xf32, #tpu.memory_space<vmem>>, %arg4: memref<32x64xbf16, #tpu.memory_space<vmem>>, %arg5: memref<32x64xbf16, #tpu.memory_space<vmem>>, %arg6: memref<20x64xbf16, #tpu.memory_space<vmem>>) attributes {dimension_semantics = [#tpu.dimension_semantics<parallel>, #tpu.dimension_semantics<parallel>], iteration_bounds = array<i64: 1, 1>, scalar_prefetch = 0 : i64, scratch_operands = 0 : i64, tpu.core_type = #tpu.core_type<tc>, window_params = [{transform_indices = @transform_0, window_bounds = array<i64: 20, 32>}, {pipeline_mode = #tpu.pipeline_mode<synchronous>, transform_indices = @transform_1, window_bounds = array<i64: 1, 32>}, {transform_indices = @transform_2, window_bounds = array<i64: 32, 64>}, {transform_indices = @transform_3, window_bounds = array<i64: 32, 64>}, {transform_indices = @transform_4, window_bounds = array<i64: 20, 64>}]} {
    %c0 = arith.constant 0 : index
    %c0_0 = arith.constant 0 : index
    %0 = vector.load %arg2[%c0, %c0_0] : memref<20x32xf32, #tpu.memory_space<vmem>>, vector<20x32xf32>
    %1 = arith.mulf %0, %0 : vector<20x32xf32>
    %cst = arith.constant dense<0.000000e+00> : vector<20xf32>
    %2 = vector.multi_reduction <add>, %1, %cst [1] : vector<20x32xf32> to vector<20xf32>
    %3 = vector.shape_cast %2 : vector<20xf32> to vector<20x1xf32>
    %cst_1 = arith.constant 3.200000e+01 : f32
    %4 = vector.broadcast %cst_1 : f32 to vector<20x1xf32>
    %5 = arith.divf %3, %4 : vector<20x1xf32>
    %cst_2 = arith.constant 9.99999974E-6 : f32
    %6 = vector.broadcast %cst_2 : f32 to vector<20x1xf32>
    %7 = arith.addf %5, %6 : vector<20x1xf32>
    %8 = math.rsqrt %7 : vector<20x1xf32>
    %9 = vector.broadcast %8 : vector<20x1xf32> to vector<20x32xf32>
    %10 = arith.mulf %0, %9 : vector<20x32xf32>
    %c0_3 = arith.constant 0 : index
    %c0_4 = arith.constant 0 : index
    %11 = vector.load %arg3[%c0_3, %c0_4] : memref<1x32xf32, #tpu.memory_space<vmem>>, vector<1x32xf32>
    %12 = vector.broadcast %11 : vector<1x32xf32> to vector<20x32xf32>
    %13 = arith.mulf %10, %12 : vector<20x32xf32>
    %14 = arith.truncf %13 : vector<20x32xf32> to vector<20x32xbf16>
    %c0_5 = arith.constant 0 : index
    %c0_6 = arith.constant 0 : index
    %15 = vector.load %arg4[%c0_5, %c0_6] : memref<32x64xbf16, #tpu.memory_space<vmem>>, vector<32x64xbf16>
    %cst_7 = arith.constant dense<0.000000e+00> : vector<20x64xf32>
    %16 = tpu.matmul %14, %15, %cst_7 {dimension_numbers = #tpu.dot_dimension_numbers<[1], [0], [0], [1], [0, 0, 1, 1], [], []>} : vector<20x32xbf16>, vector<32x64xbf16>, vector<20x64xf32> -> vector<20x64xf32>
    %c0_8 = arith.constant 0 : index
    %c0_9 = arith.constant 0 : index
    %17 = vector.load %arg5[%c0_8, %c0_9] : memref<32x64xbf16, #tpu.memory_space<vmem>>, vector<32x64xbf16>
    %cst_10 = arith.constant dense<0.000000e+00> : vector<20x64xf32>
    %18 = tpu.matmul %14, %17, %cst_10 {dimension_numbers = #tpu.dot_dimension_numbers<[1], [0], [0], [1], [0, 0, 1, 1], [], []>} : vector<20x32xbf16>, vector<32x64xbf16>, vector<20x64xf32> -> vector<20x64xf32>
    %cst_11 = arith.constant 5.000000e-01 : f32
    %19 = vector.broadcast %cst_11 : f32 to vector<20x64xf32>
    %20 = arith.mulf %19, %16 : vector<20x64xf32>
    %21 = math.tanh %20 : vector<20x64xf32>
    %cst_12 = arith.constant 1.000000e+00 : f32
    %22 = vector.broadcast %cst_12 : f32 to vector<20x64xf32>
    %23 = arith.addf %21, %22 : vector<20x64xf32>
    %cst_13 = arith.constant 5.000000e-01 : f32
    %24 = vector.broadcast %cst_13 : f32 to vector<20x64xf32>
    %25 = arith.mulf %24, %23 : vector<20x64xf32>
    %26 = arith.mulf %16, %25 : vector<20x64xf32>
    %27 = arith.mulf %26, %18 : vector<20x64xf32>
    %28 = arith.truncf %27 : vector<20x64xf32> to vector<20x64xbf16>
    %c0_14 = arith.constant 0 : index
    %c0_15 = arith.constant 0 : index
    %29 = vector.load %arg6[%c0_14, %c0_15] : memref<20x64xbf16, #tpu.memory_space<vmem>>, vector<20x64xbf16>
    tpu.vector_store %arg6[%c0_14, %c0_15], %28 {strides = array<i32>} : memref<20x64xbf16, #tpu.memory_space<vmem>>, vector<20x64xbf16>,
    return
  }
  func.func @transform_0(%arg0: i32, %arg1: i32) -> (i32, i32) {
    %c0_i32 = arith.constant 0 : i32
    %c0_i32_0 = arith.constant 0 : i32
    return %arg0, %c0_i32 : i32, i32
  }
  func.func @transform_1(%arg0: i32, %arg1: i32) -> (i32, i32) {
    %c0_i32 = arith.constant 0 : i32
    %c0_i32_0 = arith.constant 0 : i32
    %c0_i32_1 = arith.constant 0 : i32
    return %c0_i32, %c0_i32_0 : i32, i32
  }
  func.func @transform_2(%arg0: i32, %arg1: i32) -> (i32, i32) {
    %c0_i32 = arith.constant 0 : i32
    %c0_i32_0 = arith.constant 0 : i32
    return %c0_i32, %arg1 : i32, i32
  }
  func.func @transform_3(%arg0: i32, %arg1: i32) -> (i32, i32) {
    %c0_i32 = arith.constant 0 : i32
    %c0_i32_0 = arith.constant 0 : i32
    return %c0_i32, %arg1 : i32, i32
  }
  func.func @transform_4(%arg0: i32, %arg1: i32) -> (i32, i32) {
    %c0_i32 = arith.constant 0 : i32
    return %arg0, %arg1 : i32, i32
  }
}

module attributes {stable_mosaic.version = 11 : i64} {
  func.func @_mm_res_kernel(%arg0: i32, %arg1: i32, %arg2: memref<20x64xbf16, #tpu.memory_space<vmem>>, %arg3: memref<64x32xbf16, #tpu.memory_space<vmem>>, %arg4: memref<20x32xf32, #tpu.memory_space<vmem>>, %arg5: memref<20x32xf32, #tpu.memory_space<vmem>>) attributes {dimension_semantics = [#tpu.dimension_semantics<parallel>, #tpu.dimension_semantics<parallel>], iteration_bounds = array<i64: 1, 1>, scalar_prefetch = 0 : i64, scratch_operands = 0 : i64, tpu.core_type = #tpu.core_type<tc>, window_params = [{transform_indices = @transform_0, window_bounds = array<i64: 20, 64>}, {transform_indices = @transform_1, window_bounds = array<i64: 64, 32>}, {transform_indices = @transform_2, window_bounds = array<i64: 20, 32>}, {transform_indices = @transform_3, window_bounds = array<i64: 20, 32>}]} {
    %c0 = arith.constant 0 : index
    %c0_0 = arith.constant 0 : index
    %0 = vector.load %arg2[%c0, %c0_0] : memref<20x64xbf16, #tpu.memory_space<vmem>>, vector<20x64xbf16>
    %c0_1 = arith.constant 0 : index
    %c0_2 = arith.constant 0 : index
    %1 = vector.load %arg3[%c0_1, %c0_2] : memref<64x32xbf16, #tpu.memory_space<vmem>>, vector<64x32xbf16>
    %cst = arith.constant dense<0.000000e+00> : vector<20x32xf32>
    %2 = tpu.matmul %0, %1, %cst {dimension_numbers = #tpu.dot_dimension_numbers<[1], [0], [0], [1], [0, 0, 1, 1], [], []>} : vector<20x64xbf16>, vector<64x32xbf16>, vector<20x32xf32> -> vector<20x32xf32>
    %c0_3 = arith.constant 0 : index
    %c0_4 = arith.constant 0 : index
    %3 = vector.load %arg4[%c0_3, %c0_4] : memref<20x32xf32, #tpu.memory_space<vmem>>, vector<20x32xf32>
    %4 = arith.addf %2, %3 : vector<20x32xf32>
    %c0_5 = arith.constant 0 : index
    %c0_6 = arith.constant 0 : index
    %5 = vector.load %arg5[%c0_5, %c0_6] : memref<20x32xf32, #tpu.memory_space<vmem>>, vector<20x32xf32>
    tpu.vector_store %arg5[%c0_5, %c0_6], %4 {strides = array<i32>} : memref<20x32xf32, #tpu.memory_space<vmem>>, vector<20x32xf32>,
    return
  }
  func.func @transform_0(%arg0: i32, %arg1: i32) -> (i32, i32) {
    %c0_i32 = arith.constant 0 : i32
    %c0_i32_0 = arith.constant 0 : i32
    return %arg0, %c0_i32 : i32, i32
  }
  func.func @transform_1(%arg0: i32, %arg1: i32) -> (i32, i32) {
    %c0_i32 = arith.constant 0 : i32
    %c0_i32_0 = arith.constant 0 : i32
    return %c0_i32, %arg1 : i32, i32
  }
  func.func @transform_2(%arg0: i32, %arg1: i32) -> (i32, i32) {
    %c0_i32 = arith.constant 0 : i32
    return %arg0, %arg1 : i32, i32
  }
  func.func @transform_3(%arg0: i32, %arg1: i32) -> (i32, i32) {
    %c0_i32 = arith.constant 0 : i32
    return %arg0, %arg1 : i32, i32
  }
}

module attributes {stable_mosaic.version = 11 : i64} {
  func.func @_rmsnorm_kernel(%arg0: i32, %arg1: memref<16x32xf32, #tpu.memory_space<vmem>>, %arg2: memref<1x32xf32, #tpu.memory_space<vmem>>, %arg3: memref<16x32xbf16, #tpu.memory_space<vmem>>) attributes {dimension_semantics = [#tpu.dimension_semantics<parallel>], iteration_bounds = array<i64: 1>, scalar_prefetch = 0 : i64, scratch_operands = 0 : i64, tpu.core_type = #tpu.core_type<tc>, window_params = [{transform_indices = @transform_0, window_bounds = array<i64: 16, 32>}, {pipeline_mode = #tpu.pipeline_mode<synchronous>, transform_indices = @transform_1, window_bounds = array<i64: 1, 32>}, {transform_indices = @transform_2, window_bounds = array<i64: 16, 32>}]} {
    %c0 = arith.constant 0 : index
    %c0_0 = arith.constant 0 : index
    %0 = vector.load %arg1[%c0, %c0_0] : memref<16x32xf32, #tpu.memory_space<vmem>>, vector<16x32xf32>
    %1 = arith.mulf %0, %0 : vector<16x32xf32>
    %cst = arith.constant dense<0.000000e+00> : vector<16xf32>
    %2 = vector.multi_reduction <add>, %1, %cst [1] : vector<16x32xf32> to vector<16xf32>
    %3 = vector.shape_cast %2 : vector<16xf32> to vector<16x1xf32>
    %cst_1 = arith.constant 3.200000e+01 : f32
    %4 = vector.broadcast %cst_1 : f32 to vector<16x1xf32>
    %5 = arith.divf %3, %4 : vector<16x1xf32>
    %cst_2 = arith.constant 9.99999974E-6 : f32
    %6 = vector.broadcast %cst_2 : f32 to vector<16x1xf32>
    %7 = arith.addf %5, %6 : vector<16x1xf32>
    %8 = math.rsqrt %7 : vector<16x1xf32>
    %9 = vector.broadcast %8 : vector<16x1xf32> to vector<16x32xf32>
    %10 = arith.mulf %0, %9 : vector<16x32xf32>
    %c0_3 = arith.constant 0 : index
    %c0_4 = arith.constant 0 : index
    %11 = vector.load %arg2[%c0_3, %c0_4] : memref<1x32xf32, #tpu.memory_space<vmem>>, vector<1x32xf32>
    %12 = vector.broadcast %11 : vector<1x32xf32> to vector<16x32xf32>
    %13 = arith.mulf %10, %12 : vector<16x32xf32>
    %14 = arith.truncf %13 : vector<16x32xf32> to vector<16x32xbf16>
    %c0_5 = arith.constant 0 : index
    %c0_6 = arith.constant 0 : index
    %15 = vector.load %arg3[%c0_5, %c0_6] : memref<16x32xbf16, #tpu.memory_space<vmem>>, vector<16x32xbf16>
    tpu.vector_store %arg3[%c0_5, %c0_6], %14 {strides = array<i32>} : memref<16x32xbf16, #tpu.memory_space<vmem>>, vector<16x32xbf16>,
    return
  }
  func.func @transform_0(%arg0: i32) -> (i32, i32) {
    %c0_i32 = arith.constant 0 : i32
    %c0_i32_0 = arith.constant 0 : i32
    return %arg0, %c0_i32 : i32, i32
  }
  func.func @transform_1(%arg0: i32) -> (i32, i32) {
    %c0_i32 = arith.constant 0 : i32
    %c0_i32_0 = arith.constant 0 : i32
    %c0_i32_1 = arith.constant 0 : i32
    return %c0_i32, %c0_i32_0 : i32, i32
  }
  func.func @transform_2(%arg0: i32) -> (i32, i32) {
    %c0_i32 = arith.constant 0 : i32
    %c0_i32_0 = arith.constant 0 : i32
    return %arg0, %c0_i32 : i32, i32
  }
}

module attributes {stable_mosaic.version = 11 : i64} {
  func.func @_mm_kernel(%arg0: i32, %arg1: i32, %arg2: memref<4x128xbf16, #tpu.memory_space<vmem>>, %arg3: memref<128x32xbf16, #tpu.memory_space<vmem>>, %arg4: memref<4x32xf32, #tpu.memory_space<vmem>>) attributes {dimension_semantics = [#tpu.dimension_semantics<parallel>, #tpu.dimension_semantics<parallel>], iteration_bounds = array<i64: 1, 1>, scalar_prefetch = 0 : i64, scratch_operands = 0 : i64, tpu.core_type = #tpu.core_type<tc>, window_params = [{transform_indices = @transform_0, window_bounds = array<i64: 4, 128>}, {transform_indices = @transform_1, window_bounds = array<i64: 128, 32>}, {transform_indices = @transform_2, window_bounds = array<i64: 4, 32>}]} {
    %c0 = arith.constant 0 : index
    %c0_0 = arith.constant 0 : index
    %0 = vector.load %arg2[%c0, %c0_0] : memref<4x128xbf16, #tpu.memory_space<vmem>>, vector<4x128xbf16>
    %c0_1 = arith.constant 0 : index
    %c0_2 = arith.constant 0 : index
    %1 = vector.load %arg3[%c0_1, %c0_2] : memref<128x32xbf16, #tpu.memory_space<vmem>>, vector<128x32xbf16>
    %cst = arith.constant dense<0.000000e+00> : vector<4x32xf32>
    %2 = tpu.matmul %0, %1, %cst {dimension_numbers = #tpu.dot_dimension_numbers<[1], [0], [0], [1], [0, 0, 1, 1], [], []>} : vector<4x128xbf16>, vector<128x32xbf16>, vector<4x32xf32> -> vector<4x32xf32>
    %c0_3 = arith.constant 0 : index
    %c0_4 = arith.constant 0 : index
    %3 = vector.load %arg4[%c0_3, %c0_4] : memref<4x32xf32, #tpu.memory_space<vmem>>, vector<4x32xf32>
    tpu.vector_store %arg4[%c0_3, %c0_4], %2 {strides = array<i32>} : memref<4x32xf32, #tpu.memory_space<vmem>>, vector<4x32xf32>,
    return
  }
  func.func @transform_0(%arg0: i32, %arg1: i32) -> (i32, i32) {
    %c0_i32 = arith.constant 0 : i32
    %c0_i32_0 = arith.constant 0 : i32
    return %arg0, %c0_i32 : i32, i32
  }
  func.func @transform_1(%arg0: i32, %arg1: i32) -> (i32, i32) {
    %c0_i32 = arith.constant 0 : i32
    %c0_i32_0 = arith.constant 0 : i32
    return %c0_i32, %arg1 : i32, i32
  }
  func.func @transform_2(%arg0: i32, %arg1: i32) -> (i32, i32) {
    %c0_i32 = arith.constant 0 : i32
    return %arg0, %arg1 : i32, i32
  }
}

module attributes {stable_mosaic.version = 11 : i64} {
  func.func @_norm_mm_kernel(%arg0: i32, %arg1: i32, %arg2: memref<22x32xf32, #tpu.memory_space<vmem>>, %arg3: memref<1x32xf32, #tpu.memory_space<vmem>>, %arg4: memref<32x96xbf16, #tpu.memory_space<vmem>>, %arg5: memref<22x96xbf16, #tpu.memory_space<vmem>>) attributes {dimension_semantics = [#tpu.dimension_semantics<parallel>, #tpu.dimension_semantics<parallel>], iteration_bounds = array<i64: 1, 1>, scalar_prefetch = 0 : i64, scratch_operands = 0 : i64, tpu.core_type = #tpu.core_type<tc>, window_params = [{transform_indices = @transform_0, window_bounds = array<i64: 22, 32>}, {pipeline_mode = #tpu.pipeline_mode<synchronous>, transform_indices = @transform_1, window_bounds = array<i64: 1, 32>}, {transform_indices = @transform_2, window_bounds = array<i64: 32, 96>}, {transform_indices = @transform_3, window_bounds = array<i64: 22, 96>}]} {
    %c0 = arith.constant 0 : index
    %c0_0 = arith.constant 0 : index
    %0 = vector.load %arg2[%c0, %c0_0] : memref<22x32xf32, #tpu.memory_space<vmem>>, vector<22x32xf32>
    %1 = arith.mulf %0, %0 : vector<22x32xf32>
    %cst = arith.constant dense<0.000000e+00> : vector<22xf32>
    %2 = vector.multi_reduction <add>, %1, %cst [1] : vector<22x32xf32> to vector<22xf32>
    %3 = vector.shape_cast %2 : vector<22xf32> to vector<22x1xf32>
    %cst_1 = arith.constant 3.200000e+01 : f32
    %4 = vector.broadcast %cst_1 : f32 to vector<22x1xf32>
    %5 = arith.divf %3, %4 : vector<22x1xf32>
    %cst_2 = arith.constant 9.99999974E-6 : f32
    %6 = vector.broadcast %cst_2 : f32 to vector<22x1xf32>
    %7 = arith.addf %5, %6 : vector<22x1xf32>
    %8 = math.rsqrt %7 : vector<22x1xf32>
    %9 = vector.broadcast %8 : vector<22x1xf32> to vector<22x32xf32>
    %10 = arith.mulf %0, %9 : vector<22x32xf32>
    %c0_3 = arith.constant 0 : index
    %c0_4 = arith.constant 0 : index
    %11 = vector.load %arg3[%c0_3, %c0_4] : memref<1x32xf32, #tpu.memory_space<vmem>>, vector<1x32xf32>
    %12 = vector.broadcast %11 : vector<1x32xf32> to vector<22x32xf32>
    %13 = arith.mulf %10, %12 : vector<22x32xf32>
    %14 = arith.truncf %13 : vector<22x32xf32> to vector<22x32xbf16>
    %c0_5 = arith.constant 0 : index
    %c0_6 = arith.constant 0 : index
    %15 = vector.load %arg4[%c0_5, %c0_6] : memref<32x96xbf16, #tpu.memory_space<vmem>>, vector<32x96xbf16>
    %cst_7 = arith.constant dense<0.000000e+00> : vector<22x96xf32>
    %16 = tpu.matmul %14, %15, %cst_7 {dimension_numbers = #tpu.dot_dimension_numbers<[1], [0], [0], [1], [0, 0, 1, 1], [], []>} : vector<22x32xbf16>, vector<32x96xbf16>, vector<22x96xf32> -> vector<22x96xf32>
    %17 = arith.truncf %16 : vector<22x96xf32> to vector<22x96xbf16>
    %c0_8 = arith.constant 0 : index
    %c0_9 = arith.constant 0 : index
    %18 = vector.load %arg5[%c0_8, %c0_9] : memref<22x96xbf16, #tpu.memory_space<vmem>>, vector<22x96xbf16>
    tpu.vector_store %arg5[%c0_8, %c0_9], %17 {strides = array<i32>} : memref<22x96xbf16, #tpu.memory_space<vmem>>, vector<22x96xbf16>,
    return
  }
  func.func @transform_0(%arg0: i32, %arg1: i32) -> (i32, i32) {
    %c0_i32 = arith.constant 0 : i32
    %c0_i32_0 = arith.constant 0 : i32
    return %arg0, %c0_i32 : i32, i32
  }
  func.func @transform_1(%arg0: i32, %arg1: i32) -> (i32, i32) {
    %c0_i32 = arith.constant 0 : i32
    %c0_i32_0 = arith.constant 0 : i32
    %c0_i32_1 = arith.constant 0 : i32
    return %c0_i32, %c0_i32_0 : i32, i32
  }
  func.func @transform_2(%arg0: i32, %arg1: i32) -> (i32, i32) {
    %c0_i32 = arith.constant 0 : i32
    %c0_i32_0 = arith.constant 0 : i32
    return %c0_i32, %arg1 : i32, i32
  }
  func.func @transform_3(%arg0: i32, %arg1: i32) -> (i32, i32) {
    %c0_i32 = arith.constant 0 : i32
    return %arg0, %arg1 : i32, i32
  }
}

module attributes {stable_mosaic.version = 11 : i64} {
  func.func @_attn_kernel(%arg0: i32, %arg1: memref<1x4x11x8xbf16, #tpu.memory_space<vmem>>, %arg2: memref<1x4x11x8xbf16, #tpu.memory_space<vmem>>, %arg3: memref<1x4x11x8xbf16, #tpu.memory_space<vmem>>, %arg4: memref<11x11xf32, #tpu.memory_space<vmem>>, %arg5: memref<1x4x11x8xbf16, #tpu.memory_space<vmem>>) attributes {dimension_semantics = [#tpu.dimension_semantics<parallel>], iteration_bounds = array<i64: 2>, scalar_prefetch = 0 : i64, scratch_operands = 0 : i64, tpu.core_type = #tpu.core_type<tc>, window_params = [{transform_indices = @transform_0, window_bounds = array<i64: 1, 4, 11, 8>}, {transform_indices = @transform_1, window_bounds = array<i64: 1, 4, 11, 8>}, {transform_indices = @transform_2, window_bounds = array<i64: 1, 4, 11, 8>}, {pipeline_mode = #tpu.pipeline_mode<synchronous>, transform_indices = @transform_3, window_bounds = array<i64: 11, 11>}, {transform_indices = @transform_4, window_bounds = array<i64: 1, 4, 11, 8>}]} {
    %c0 = arith.constant 0 : index
    %c0_0 = arith.constant 0 : index
    %c0_1 = arith.constant 0 : index
    %c0_2 = arith.constant 0 : index
    %0 = vector.load %arg1[%c0, %c0_0, %c0_1, %c0_2] : memref<1x4x11x8xbf16, #tpu.memory_space<vmem>>, vector<1x4x11x8xbf16>
    %1 = vector.shape_cast %0 : vector<1x4x11x8xbf16> to vector<4x11x8xbf16>
    %c0_3 = arith.constant 0 : index
    %c0_4 = arith.constant 0 : index
    %c0_5 = arith.constant 0 : index
    %c0_6 = arith.constant 0 : index
    %2 = vector.load %arg2[%c0_3, %c0_4, %c0_5, %c0_6] : memref<1x4x11x8xbf16, #tpu.memory_space<vmem>>, vector<1x4x11x8xbf16>
    %3 = vector.shape_cast %2 : vector<1x4x11x8xbf16> to vector<4x11x8xbf16>
    %c0_7 = arith.constant 0 : index
    %c0_8 = arith.constant 0 : index
    %c0_9 = arith.constant 0 : index
    %c0_10 = arith.constant 0 : index
    %4 = vector.load %arg3[%c0_7, %c0_8, %c0_9, %c0_10] : memref<1x4x11x8xbf16, #tpu.memory_space<vmem>>, vector<1x4x11x8xbf16>
    %5 = vector.shape_cast %4 : vector<1x4x11x8xbf16> to vector<4x11x8xbf16>
    %cst = arith.constant dense<0.000000e+00> : vector<4x11x11xf32>
    %6 = tpu.matmul %1, %3, %cst {dimension_numbers = #tpu.dot_dimension_numbers<[2], [2], [1], [1], [0, 0, 0, 1, 1, 1], [0], [0]>} : vector<4x11x8xbf16>, vector<4x11x8xbf16>, vector<4x11x11xf32> -> vector<4x11x11xf32>
    %cst_11 = arith.constant 0.353553385 : f32
    %7 = vector.broadcast %cst_11 : f32 to vector<4x11x11xf32>
    %8 = arith.mulf %6, %7 : vector<4x11x11xf32>
    %c0_12 = arith.constant 0 : index
    %c0_13 = arith.constant 0 : index
    %9 = vector.load %arg4[%c0_12, %c0_13] : memref<11x11xf32, #tpu.memory_space<vmem>>, vector<11x11xf32>
    %10 = vector.shape_cast %9 : vector<11x11xf32> to vector<1x11x11xf32>
    %11 = vector.broadcast %10 : vector<1x11x11xf32> to vector<4x11x11xf32>
    %12 = arith.addf %8, %11 : vector<4x11x11xf32>
    %cst_14 = arith.constant dense<0xFF800000> : vector<4x11xf32>
    %13 = vector.multi_reduction <maximumf>, %12, %cst_14 [2] : vector<4x11x11xf32> to vector<4x11xf32>
    %14 = vector.shape_cast %13 : vector<4x11xf32> to vector<4x11x1xf32>
    %15 = vector.broadcast %14 : vector<4x11x1xf32> to vector<4x11x11xf32>
    %16 = arith.subf %12, %15 : vector<4x11x11xf32>
    %17 = math.exp %16 : vector<4x11x11xf32>
    %cst_15 = arith.constant dense<0.000000e+00> : vector<4x11xf32>
    %18 = vector.multi_reduction <add>, %17, %cst_15 [2] : vector<4x11x11xf32> to vector<4x11xf32>
    %19 = vector.shape_cast %18 : vector<4x11xf32> to vector<4x11x1xf32>
    %20 = vector.broadcast %19 : vector<4x11x1xf32> to vector<4x11x11xf32>
    %21 = arith.divf %17, %20 : vector<4x11x11xf32>
    %22 = arith.truncf %21 : vector<4x11x11xf32> to vector<4x11x11xbf16>
    %cst_16 = arith.constant dense<0.000000e+00> : vector<4x11x8xf32>
    %23 = tpu.matmul %22, %5, %cst_16 {dimension_numbers = #tpu.dot_dimension_numbers<[2], [1], [1], [2], [0, 0, 0, 1, 1, 2], [0], [0]>} : vector<4x11x11xbf16>, vector<4x11x8xbf16>, vector<4x11x8xf32> -> vector<4x11x8xf32>
    %24 = arith.truncf %23 : vector<4x11x8xf32> to vector<4x11x8xbf16>
    %c0_17 = arith.constant 0 : index
    %c0_18 = arith.constant 0 : index
    %c0_19 = arith.constant 0 : index
    %c0_20 = arith.constant 0 : index
    %25 = vector.load %arg5[%c0_17, %c0_18, %c0_19, %c0_20] : memref<1x4x11x8xbf16, #tpu.memory_space<vmem>>, vector<1x4x11x8xbf16>
    %26 = vector.shape_cast %25 : vector<1x4x11x8xbf16> to vector<4x11x8xbf16>
    %27 = vector.shape_cast %24 : vector<4x11x8xbf16> to vector<1x4x11x8xbf16>
    tpu.vector_store %arg5[%c0_17, %c0_18, %c0_19, %c0_20], %27 {strides = array<i32>} : memref<1x4x11x8xbf16, #tpu.memory_space<vmem>>, vector<1x4x11x8xbf16>,
    return
  }
  func.func @transform_0(%arg0: i32) -> (i32, i32, i32, i32) {
    %c0_i32 = arith.constant 0 : i32
    %c0_i32_0 = arith.constant 0 : i32
    %c0_i32_1 = arith.constant 0 : i32
    %c0_i32_2 = arith.constant 0 : i32
    return %arg0, %c0_i32, %c0_i32_0, %c0_i32_1 : i32, i32, i32, i32
  }
  func.func @transform_1(%arg0: i32) -> (i32, i32, i32, i32) {
    %c0_i32 = arith.constant 0 : i32
    %c0_i32_0 = arith.constant 0 : i32
    %c0_i32_1 = arith.constant 0 : i32
    %c0_i32_2 = arith.constant 0 : i32
    return %arg0, %c0_i32, %c0_i32_0, %c0_i32_1 : i32, i32, i32, i32
  }
  func.func @transform_2(%arg0: i32) -> (i32, i32, i32, i32) {
    %c0_i32 = arith.constant 0 : i32
    %c0_i32_0 = arith.constant 0 : i32
    %c0_i32_1 = arith.constant 0 : i32
    %c0_i32_2 = arith.constant 0 : i32
    return %arg0, %c0_i32, %c0_i32_0, %c0_i32_1 : i32, i32, i32, i32
  }
  func.func @transform_3(%arg0: i32) -> (i32, i32) {
    %c0_i32 = arith.constant 0 : i32
    %c0_i32_0 = arith.constant 0 : i32
    %c0_i32_1 = arith.constant 0 : i32
    return %c0_i32, %c0_i32_0 : i32, i32
  }
  func.func @transform_4(%arg0: i32) -> (i32, i32, i32, i32) {
    %c0_i32 = arith.constant 0 : i32
    %c0_i32_0 = arith.constant 0 : i32
    %c0_i32_1 = arith.constant 0 : i32
    %c0_i32_2 = arith.constant 0 : i32
    return %arg0, %c0_i32, %c0_i32_0, %c0_i32_1 : i32, i32, i32, i32
  }
}

module attributes {stable_mosaic.version = 11 : i64} {
  func.func @_mm_res_kernel(%arg0: i32, %arg1: i32, %arg2: memref<22x32xbf16, #tpu.memory_space<vmem>>, %arg3: memref<32x32xbf16, #tpu.memory_space<vmem>>, %arg4: memref<22x32xf32, #tpu.memory_space<vmem>>, %arg5: memref<22x32xf32, #tpu.memory_space<vmem>>) attributes {dimension_semantics = [#tpu.dimension_semantics<parallel>, #tpu.dimension_semantics<parallel>], iteration_bounds = array<i64: 1, 1>, scalar_prefetch = 0 : i64, scratch_operands = 0 : i64, tpu.core_type = #tpu.core_type<tc>, window_params = [{transform_indices = @transform_0, window_bounds = array<i64: 22, 32>}, {transform_indices = @transform_1, window_bounds = array<i64: 32, 32>}, {transform_indices = @transform_2, window_bounds = array<i64: 22, 32>}, {transform_indices = @transform_3, window_bounds = array<i64: 22, 32>}]} {
    %c0 = arith.constant 0 : index
    %c0_0 = arith.constant 0 : index
    %0 = vector.load %arg2[%c0, %c0_0] : memref<22x32xbf16, #tpu.memory_space<vmem>>, vector<22x32xbf16>
    %c0_1 = arith.constant 0 : index
    %c0_2 = arith.constant 0 : index
    %1 = vector.load %arg3[%c0_1, %c0_2] : memref<32x32xbf16, #tpu.memory_space<vmem>>, vector<32x32xbf16>
    %cst = arith.constant dense<0.000000e+00> : vector<22x32xf32>
    %2 = tpu.matmul %0, %1, %cst {dimension_numbers = #tpu.dot_dimension_numbers<[1], [0], [0], [1], [0, 0, 1, 1], [], []>} : vector<22x32xbf16>, vector<32x32xbf16>, vector<22x32xf32> -> vector<22x32xf32>
    %c0_3 = arith.constant 0 : index
    %c0_4 = arith.constant 0 : index
    %3 = vector.load %arg4[%c0_3, %c0_4] : memref<22x32xf32, #tpu.memory_space<vmem>>, vector<22x32xf32>
    %4 = arith.addf %2, %3 : vector<22x32xf32>
    %c0_5 = arith.constant 0 : index
    %c0_6 = arith.constant 0 : index
    %5 = vector.load %arg5[%c0_5, %c0_6] : memref<22x32xf32, #tpu.memory_space<vmem>>, vector<22x32xf32>
    tpu.vector_store %arg5[%c0_5, %c0_6], %4 {strides = array<i32>} : memref<22x32xf32, #tpu.memory_space<vmem>>, vector<22x32xf32>,
    return
  }
  func.func @transform_0(%arg0: i32, %arg1: i32) -> (i32, i32) {
    %c0_i32 = arith.constant 0 : i32
    %c0_i32_0 = arith.constant 0 : i32
    return %arg0, %c0_i32 : i32, i32
  }
  func.func @transform_1(%arg0: i32, %arg1: i32) -> (i32, i32) {
    %c0_i32 = arith.constant 0 : i32
    %c0_i32_0 = arith.constant 0 : i32
    return %c0_i32, %arg1 : i32, i32
  }
  func.func @transform_2(%arg0: i32, %arg1: i32) -> (i32, i32) {
    %c0_i32 = arith.constant 0 : i32
    return %arg0, %arg1 : i32, i32
  }
  func.func @transform_3(%arg0: i32, %arg1: i32) -> (i32, i32) {
    %c0_i32 = arith.constant 0 : i32
    return %arg0, %arg1 : i32, i32
  }
}

module attributes {stable_mosaic.version = 11 : i64} {
  func.func @_norm_ffn_kernel(%arg0: i32, %arg1: i32, %arg2: memref<22x32xf32, #tpu.memory_space<vmem>>, %arg3: memref<1x32xf32, #tpu.memory_space<vmem>>, %arg4: memref<32x64xbf16, #tpu.memory_space<vmem>>, %arg5: memref<32x64xbf16, #tpu.memory_space<vmem>>, %arg6: memref<22x64xbf16, #tpu.memory_space<vmem>>) attributes {dimension_semantics = [#tpu.dimension_semantics<parallel>, #tpu.dimension_semantics<parallel>], iteration_bounds = array<i64: 1, 1>, scalar_prefetch = 0 : i64, scratch_operands = 0 : i64, tpu.core_type = #tpu.core_type<tc>, window_params = [{transform_indices = @transform_0, window_bounds = array<i64: 22, 32>}, {pipeline_mode = #tpu.pipeline_mode<synchronous>, transform_indices = @transform_1, window_bounds = array<i64: 1, 32>}, {transform_indices = @transform_2, window_bounds = array<i64: 32, 64>}, {transform_indices = @transform_3, window_bounds = array<i64: 32, 64>}, {transform_indices = @transform_4, window_bounds = array<i64: 22, 64>}]} {
    %c0 = arith.constant 0 : index
    %c0_0 = arith.constant 0 : index
    %0 = vector.load %arg2[%c0, %c0_0] : memref<22x32xf32, #tpu.memory_space<vmem>>, vector<22x32xf32>
    %1 = arith.mulf %0, %0 : vector<22x32xf32>
    %cst = arith.constant dense<0.000000e+00> : vector<22xf32>
    %2 = vector.multi_reduction <add>, %1, %cst [1] : vector<22x32xf32> to vector<22xf32>
    %3 = vector.shape_cast %2 : vector<22xf32> to vector<22x1xf32>
    %cst_1 = arith.constant 3.200000e+01 : f32
    %4 = vector.broadcast %cst_1 : f32 to vector<22x1xf32>
    %5 = arith.divf %3, %4 : vector<22x1xf32>
    %cst_2 = arith.constant 9.99999974E-6 : f32
    %6 = vector.broadcast %cst_2 : f32 to vector<22x1xf32>
    %7 = arith.addf %5, %6 : vector<22x1xf32>
    %8 = math.rsqrt %7 : vector<22x1xf32>
    %9 = vector.broadcast %8 : vector<22x1xf32> to vector<22x32xf32>
    %10 = arith.mulf %0, %9 : vector<22x32xf32>
    %c0_3 = arith.constant 0 : index
    %c0_4 = arith.constant 0 : index
    %11 = vector.load %arg3[%c0_3, %c0_4] : memref<1x32xf32, #tpu.memory_space<vmem>>, vector<1x32xf32>
    %12 = vector.broadcast %11 : vector<1x32xf32> to vector<22x32xf32>
    %13 = arith.mulf %10, %12 : vector<22x32xf32>
    %14 = arith.truncf %13 : vector<22x32xf32> to vector<22x32xbf16>
    %c0_5 = arith.constant 0 : index
    %c0_6 = arith.constant 0 : index
    %15 = vector.load %arg4[%c0_5, %c0_6] : memref<32x64xbf16, #tpu.memory_space<vmem>>, vector<32x64xbf16>
    %cst_7 = arith.constant dense<0.000000e+00> : vector<22x64xf32>
    %16 = tpu.matmul %14, %15, %cst_7 {dimension_numbers = #tpu.dot_dimension_numbers<[1], [0], [0], [1], [0, 0, 1, 1], [], []>} : vector<22x32xbf16>, vector<32x64xbf16>, vector<22x64xf32> -> vector<22x64xf32>
    %c0_8 = arith.constant 0 : index
    %c0_9 = arith.constant 0 : index
    %17 = vector.load %arg5[%c0_8, %c0_9] : memref<32x64xbf16, #tpu.memory_space<vmem>>, vector<32x64xbf16>
    %cst_10 = arith.constant dense<0.000000e+00> : vector<22x64xf32>
    %18 = tpu.matmul %14, %17, %cst_10 {dimension_numbers = #tpu.dot_dimension_numbers<[1], [0], [0], [1], [0, 0, 1, 1], [], []>} : vector<22x32xbf16>, vector<32x64xbf16>, vector<22x64xf32> -> vector<22x64xf32>
    %cst_11 = arith.constant 5.000000e-01 : f32
    %19 = vector.broadcast %cst_11 : f32 to vector<22x64xf32>
    %20 = arith.mulf %19, %16 : vector<22x64xf32>
    %21 = math.tanh %20 : vector<22x64xf32>
    %cst_12 = arith.constant 1.000000e+00 : f32
    %22 = vector.broadcast %cst_12 : f32 to vector<22x64xf32>
    %23 = arith.addf %21, %22 : vector<22x64xf32>
    %cst_13 = arith.constant 5.000000e-01 : f32
    %24 = vector.broadcast %cst_13 : f32 to vector<22x64xf32>
    %25 = arith.mulf %24, %23 : vector<22x64xf32>
    %26 = arith.mulf %16, %25 : vector<22x64xf32>
    %27 = arith.mulf %26, %18 : vector<22x64xf32>
    %28 = arith.truncf %27 : vector<22x64xf32> to vector<22x64xbf16>
    %c0_14 = arith.constant 0 : index
    %c0_15 = arith.constant 0 : index
    %29 = vector.load %arg6[%c0_14, %c0_15] : memref<22x64xbf16, #tpu.memory_space<vmem>>, vector<22x64xbf16>
    tpu.vector_store %arg6[%c0_14, %c0_15], %28 {strides = array<i32>} : memref<22x64xbf16, #tpu.memory_space<vmem>>, vector<22x64xbf16>,
    return
  }
  func.func @transform_0(%arg0: i32, %arg1: i32) -> (i32, i32) {
    %c0_i32 = arith.constant 0 : i32
    %c0_i32_0 = arith.constant 0 : i32
    return %arg0, %c0_i32 : i32, i32
  }
  func.func @transform_1(%arg0: i32, %arg1: i32) -> (i32, i32) {
    %c0_i32 = arith.constant 0 : i32
    %c0_i32_0 = arith.constant 0 : i32
    %c0_i32_1 = arith.constant 0 : i32
    return %c0_i32, %c0_i32_0 : i32, i32
  }
  func.func @transform_2(%arg0: i32, %arg1: i32) -> (i32, i32) {
    %c0_i32 = arith.constant 0 : i32
    %c0_i32_0 = arith.constant 0 : i32
    return %c0_i32, %arg1 : i32, i32
  }
  func.func @transform_3(%arg0: i32, %arg1: i32) -> (i32, i32) {
    %c0_i32 = arith.constant 0 : i32
    %c0_i32_0 = arith.constant 0 : i32
    return %c0_i32, %arg1 : i32, i32
  }
  func.func @transform_4(%arg0: i32, %arg1: i32) -> (i32, i32) {
    %c0_i32 = arith.constant 0 : i32
    return %arg0, %arg1 : i32, i32
  }
}

module attributes {stable_mosaic.version = 11 : i64} {
  func.func @_mm_res_kernel(%arg0: i32, %arg1: i32, %arg2: memref<22x64xbf16, #tpu.memory_space<vmem>>, %arg3: memref<64x32xbf16, #tpu.memory_space<vmem>>, %arg4: memref<22x32xf32, #tpu.memory_space<vmem>>, %arg5: memref<22x32xf32, #tpu.memory_space<vmem>>) attributes {dimension_semantics = [#tpu.dimension_semantics<parallel>, #tpu.dimension_semantics<parallel>], iteration_bounds = array<i64: 1, 1>, scalar_prefetch = 0 : i64, scratch_operands = 0 : i64, tpu.core_type = #tpu.core_type<tc>, window_params = [{transform_indices = @transform_0, window_bounds = array<i64: 22, 64>}, {transform_indices = @transform_1, window_bounds = array<i64: 64, 32>}, {transform_indices = @transform_2, window_bounds = array<i64: 22, 32>}, {transform_indices = @transform_3, window_bounds = array<i64: 22, 32>}]} {
    %c0 = arith.constant 0 : index
    %c0_0 = arith.constant 0 : index
    %0 = vector.load %arg2[%c0, %c0_0] : memref<22x64xbf16, #tpu.memory_space<vmem>>, vector<22x64xbf16>
    %c0_1 = arith.constant 0 : index
    %c0_2 = arith.constant 0 : index
    %1 = vector.load %arg3[%c0_1, %c0_2] : memref<64x32xbf16, #tpu.memory_space<vmem>>, vector<64x32xbf16>
    %cst = arith.constant dense<0.000000e+00> : vector<22x32xf32>
    %2 = tpu.matmul %0, %1, %cst {dimension_numbers = #tpu.dot_dimension_numbers<[1], [0], [0], [1], [0, 0, 1, 1], [], []>} : vector<22x64xbf16>, vector<64x32xbf16>, vector<22x32xf32> -> vector<22x32xf32>
    %c0_3 = arith.constant 0 : index
    %c0_4 = arith.constant 0 : index
    %3 = vector.load %arg4[%c0_3, %c0_4] : memref<22x32xf32, #tpu.memory_space<vmem>>, vector<22x32xf32>
    %4 = arith.addf %2, %3 : vector<22x32xf32>
    %c0_5 = arith.constant 0 : index
    %c0_6 = arith.constant 0 : index
    %5 = vector.load %arg5[%c0_5, %c0_6] : memref<22x32xf32, #tpu.memory_space<vmem>>, vector<22x32xf32>
    tpu.vector_store %arg5[%c0_5, %c0_6], %4 {strides = array<i32>} : memref<22x32xf32, #tpu.memory_space<vmem>>, vector<22x32xf32>,
    return
  }
  func.func @transform_0(%arg0: i32, %arg1: i32) -> (i32, i32) {
    %c0_i32 = arith.constant 0 : i32
    %c0_i32_0 = arith.constant 0 : i32
    return %arg0, %c0_i32 : i32, i32
  }
  func.func @transform_1(%arg0: i32, %arg1: i32) -> (i32, i32) {
    %c0_i32 = arith.constant 0 : i32
    %c0_i32_0 = arith.constant 0 : i32
    return %c0_i32, %arg1 : i32, i32
  }
  func.func @transform_2(%arg0: i32, %arg1: i32) -> (i32, i32) {
    %c0_i32 = arith.constant 0 : i32
    return %arg0, %arg1 : i32, i32
  }
  func.func @transform_3(%arg0: i32, %arg1: i32) -> (i32, i32) {
    %c0_i32 = arith.constant 0 : i32
    return %arg0, %arg1 : i32, i32
  }
}

module attributes {stable_mosaic.version = 11 : i64} {
  func.func @_norm_mm_kernel(%arg0: i32, %arg1: i32, %arg2: memref<16x32xf32, #tpu.memory_space<vmem>>, %arg3: memref<1x32xf32, #tpu.memory_space<vmem>>, %arg4: memref<32x64xbf16, #tpu.memory_space<vmem>>, %arg5: memref<16x64xf32, #tpu.memory_space<vmem>>) attributes {dimension_semantics = [#tpu.dimension_semantics<parallel>, #tpu.dimension_semantics<parallel>], iteration_bounds = array<i64: 1, 1>, scalar_prefetch = 0 : i64, scratch_operands = 0 : i64, tpu.core_type = #tpu.core_type<tc>, window_params = [{transform_indices = @transform_0, window_bounds = array<i64: 16, 32>}, {pipeline_mode = #tpu.pipeline_mode<synchronous>, transform_indices = @transform_1, window_bounds = array<i64: 1, 32>}, {transform_indices = @transform_2, window_bounds = array<i64: 32, 64>}, {transform_indices = @transform_3, window_bounds = array<i64: 16, 64>}]} {
    %c0 = arith.constant 0 : index
    %c0_0 = arith.constant 0 : index
    %0 = vector.load %arg2[%c0, %c0_0] : memref<16x32xf32, #tpu.memory_space<vmem>>, vector<16x32xf32>
    %1 = arith.mulf %0, %0 : vector<16x32xf32>
    %cst = arith.constant dense<0.000000e+00> : vector<16xf32>
    %2 = vector.multi_reduction <add>, %1, %cst [1] : vector<16x32xf32> to vector<16xf32>
    %3 = vector.shape_cast %2 : vector<16xf32> to vector<16x1xf32>
    %cst_1 = arith.constant 3.200000e+01 : f32
    %4 = vector.broadcast %cst_1 : f32 to vector<16x1xf32>
    %5 = arith.divf %3, %4 : vector<16x1xf32>
    %cst_2 = arith.constant 9.99999974E-6 : f32
    %6 = vector.broadcast %cst_2 : f32 to vector<16x1xf32>
    %7 = arith.addf %5, %6 : vector<16x1xf32>
    %8 = math.rsqrt %7 : vector<16x1xf32>
    %9 = vector.broadcast %8 : vector<16x1xf32> to vector<16x32xf32>
    %10 = arith.mulf %0, %9 : vector<16x32xf32>
    %c0_3 = arith.constant 0 : index
    %c0_4 = arith.constant 0 : index
    %11 = vector.load %arg3[%c0_3, %c0_4] : memref<1x32xf32, #tpu.memory_space<vmem>>, vector<1x32xf32>
    %12 = vector.broadcast %11 : vector<1x32xf32> to vector<16x32xf32>
    %13 = arith.mulf %10, %12 : vector<16x32xf32>
    %14 = arith.truncf %13 : vector<16x32xf32> to vector<16x32xbf16>
    %c0_5 = arith.constant 0 : index
    %c0_6 = arith.constant 0 : index
    %15 = vector.load %arg4[%c0_5, %c0_6] : memref<32x64xbf16, #tpu.memory_space<vmem>>, vector<32x64xbf16>
    %cst_7 = arith.constant dense<0.000000e+00> : vector<16x64xf32>
    %16 = tpu.matmul %14, %15, %cst_7 {dimension_numbers = #tpu.dot_dimension_numbers<[1], [0], [0], [1], [0, 0, 1, 1], [], []>} : vector<16x32xbf16>, vector<32x64xbf16>, vector<16x64xf32> -> vector<16x64xf32>
    %c0_8 = arith.constant 0 : index
    %c0_9 = arith.constant 0 : index
    %17 = vector.load %arg5[%c0_8, %c0_9] : memref<16x64xf32, #tpu.memory_space<vmem>>, vector<16x64xf32>
    tpu.vector_store %arg5[%c0_8, %c0_9], %16 {strides = array<i32>} : memref<16x64xf32, #tpu.memory_space<vmem>>, vector<16x64xf32>,
    return
  }
  func.func @transform_0(%arg0: i32, %arg1: i32) -> (i32, i32) {
    %c0_i32 = arith.constant 0 : i32
    %c0_i32_0 = arith.constant 0 : i32
    return %arg0, %c0_i32 : i32, i32
  }
  func.func @transform_1(%arg0: i32, %arg1: i32) -> (i32, i32) {
    %c0_i32 = arith.constant 0 : i32
    %c0_i32_0 = arith.constant 0 : i32
    %c0_i32_1 = arith.constant 0 : i32
    return %c0_i32, %c0_i32_0 : i32, i32
  }
  func.func @transform_2(%arg0: i32, %arg1: i32) -> (i32, i32) {
    %c0_i32 = arith.constant 0 : i32
    %c0_i32_0 = arith.constant 0 : i32
    return %c0_i32, %arg1 : i32, i32
  }
  func.func @transform_3(%arg0: i32, %arg1: i32) -> (i32, i32) {
    %c0_i32 = arith.constant 0 : i32
    return %arg0, %arg1 : i32, i32
  }
}

</mosaic_0001>

<bundles_post_ra>
// kernel: _lambda_.23
= control target key start
LH: loop header
LB: loop body
LE: loop exit
PB: predicated region body
PF: predicated region fallthrough
CT: control target
= control target key end

     0   :  { %vm21_vm0 = vcmask 261120   ;;  %vm28_vm1 = vcmask 257024   ;;  %vm143_vm2 = vcmask 779264   ;;  %vm140_vm3 = vcmask 781312   ;;  %s231_s0 = inlined_call_operand.vmem [shape: f32[20,32], index: 0, kind: input, shape index: {}]   ;;  %s232_s2 = inlined_call_operand.vmem [shape: bf16[32,96], index: 2, kind: input, shape index: {}]   ;;  %s233_s1 = inlined_call_operand.vmem [shape: f32[1,32], index: 1, kind: input, shape index: {}]   ;;  %s234_s3 = inlined_call_operand.vmem [shape: bf16[20,96], index: 3, kind: output, shape index: {}]  }
   0x1   :  { %v15_v0 = vld [vmem:[%s231_s0] sm:$0xff]  ;;  %v16_v1 = vld [vmem:[%s231_s0 + $0x8] sm:$0xff]  ;;  %v17_v2 = vld [vmem:[%s231_s0 + $0x10] sm:$0xf] }
   0x2   :  { %v18_v3 = vmul.f32 %v15_v0, %v15_v0  ;;  %v19_v4 = vmul.f32 %v16_v1, %v16_v1  ;;  %v20_v5 = vmul.f32 %v17_v2, %v17_v2  ;;  %v172_v9 = vld [vmem:[%s232_s2] sm:$0xff]   ;;  %v173_v10 = vld [vmem:[%s232_s2 + $0x8] sm:$0xff]  }
   0x3   :  { %164 = vmatprep.subr.bf16.mxu0 %v172_v9  ;;  %v149_v24 = vld [vmem:[%s233_s1] ss:$0 sm:$0xff] }
   0x4   :  { %v22_v6 = vsel %vm21_vm0, %v18_v3, 0.0  ;;  %v29_v7 = vsel %vm28_vm1, %v20_v5, 0.0  ;;  %v25_v8 = vsel %vm21_vm0, %v19_v4, 0.0  ;;  %165 = vmatpush3.bf16.msra.mxu0 %v172_v9 }
   0x5   :  { %23 = vadd.xlane.f32.xlu0 %v22_v6  ;;  %30 = vadd.xlane.f32.xlu1 %v29_v7 }
   0x6   :  { %166 = vmatprep.subr.bf16.mxu0 %v173_v10 }
   0x8   :  { %167 = vmatpush3.bf16.msra.mxu0 %v173_v10 }
   0x9   :  { %26 = vadd.xlane.f32.xlu0 %v25_v8 }
  0x92   :  { %v24_v11 = vpop.xlane.xlu0 %23  ;;  %v31_v12 = vpop.xlane.xlu1 %30 }
  0x93   :  { %v33_v13 = vmul.f32 0.03125, %v24_v11  ;;  %v35_v14 = vmul.f32 0.03125, %v31_v12 }
  0x95   :  { %v36_v15 = vadd.f32 1e-05, %v33_v13  ;;  %v38_v16 = vadd.f32 1e-05, %v35_v14 }
  0x96   :  { %v27_v17 = vpop.xlane.xlu0 %26 }
  0x97   :  { %174 = vrsqrt.f32 %v36_v15  ;;  %v34_v18 = vmul.f32 0.03125, %v27_v17 }
  0x98   :  { %176 = vrsqrt.f32 %v38_v16 }
  0x99   :  { %v37_v19 = vadd.f32 1e-05, %v34_v18 }
  0x9b   :  { %178 = vrsqrt.f32 %v37_v19 }
  0xa1   :  { %v175_v20 = vpop.eup %174 }
  0xa2   :  { %v177_v21 = vpop.eup %176  ;;  %v42_v23 = vmul.f32 %v175_v20, %v15_v0 }
  0xa3   :  { %v44_v22 = vmul.f32 %v177_v21, %v17_v2 }
  0xa4   :  { %v52_v28 = vmul.f32 %v149_v24, %v42_v23 }
  0xa5   :  { %v179_v25 = vpop.eup %178  ;;  %v54_v26 = vmul.f32 %v149_v24, %v44_v22 }
  0xa6   :  { %v43_v27 = vmul.f32 %v179_v25, %v16_v1 }
  0xa7   :  { %v56_v30 = vpack.c.bf16 %v54_v26, %v54_v26 }
  0xa8   :  { %v53_v29 = vmul.f32 %v149_v24, %v43_v27 }
  0xaa   :  { %v55_v31 = vpack.c.bf16 %v53_v29, %v52_v28 }
  0xac   :  { %168 = vmatprep.mubr.msk.bf16.mxu0 %vm21_vm0, %v55_v31 }
  0xad   :  { %169 = vmatmul.mubr.msk.bf16.vlgmr.msra.gmra.mrb[0].mxu0 %vm21_vm0, %v56_v30 }
 0x180   :  { %v170_v32 = vpop.f32.mrb[0].mxu0 }
 0x181   :  { %v159_v33 = vpack.c.bf16 %v170_v32, %v170_v32  ;;  %v113_v34 = vpop.f32.mrb[1].mxu0 }
 0x182   :  { %v157_v35 = vpack.c.bf16 %v113_v34, %v113_v34  ;;  %v171_v36 = vpop.f32.mrb[2].mxu0 }
 0x183   :  { %144 = vst.msk [vmem:[%s234_s3 + $0x8] sm:$0x3] %vm143_vm2, %v159_v33  ;;  %v116_v37 = vpop.f32.mrb[3].mxu0 }
 0x184   :  { %141 = vst.msk [vmem:[%s234_s3] sm:$0xf] %vm140_vm3, %v157_v35  ;;  %v158_v38 = vpack.c.bf16 %v116_v37, %v116_v37 }
 0x186   :  { %142 = vst.msk [vmem:[%s234_s3 + $0x4] sm:$0xf] %vm140_vm3, %v158_v38 }

// kernel: _lambda_.25
= control target key start
LH: loop header
LB: loop body
LE: loop exit
PB: predicated region body
PF: predicated region fallthrough
CT: control target
= control target key end

     0   :  { %vm45_vm0 = vcmask 261120   ;;  %vm102_vm1 = vcmask 257024   ;;  %s184_s1 = inlined_call_operand.vmem [shape: bf16[32,32], index: 1, kind: input, shape index: {}]   ;;  %s185_s0 = inlined_call_operand.vmem [shape: bf16[20,32], index: 0, kind: input, shape index: {}]   ;;  %s186_s2 = inlined_call_operand.vmem [shape: f32[20,32], index: 2, kind: input, shape index: {}]   ;;  %s187_s3 = inlined_call_operand.vmem [shape: f32[20,32], index: 3, kind: output, shape index: {}]  }
   0x1   :  { %v126_v0 = vld [vmem:[%s184_s1] sm:$0xff]   ;;  %v127_v1 = vld [vmem:[%s184_s1 + $0x8] sm:$0xff]   ;;  %v24_v4 = vld [vmem:[%s186_s2 + $0x10] sm:$0xf] }
   0x2   :  { %118 = vmatprep.subr.bf16.mxu0 %v126_v0  ;;  %v128_v2 = vld [vmem:[%s185_s0] sm:$0xff]   ;;  %v129_v3 = vld [vmem:[%s185_s0 + $0x8] ss:$0 sps:$4 sm:$0x33]  }
   0x3   :  { %119 = vmatpush3.bf16.msra.mxu0 %v126_v0  ;;  %122 = vmatprep.mubr.msk.bf16.mxu0 %vm45_vm0, %v128_v2  ;;  %v22_v5 = vld [vmem:[%s186_s2] sm:$0xff]  ;;  %v23_v9 = vld [vmem:[%s186_s2 + $0x8] sm:$0xff] }
   0x4   :  { %120 = vmatprep.subr.bf16.mxu0 %v127_v1 }
   0x7   :  { %121 = vmatpush3.bf16.msra.mxu0 %v127_v1 }
   0xa   :  { %123 = vmatmul.mubr.msk.bf16.vlgmr.msra.gmra.mrb[0].mxu0 %vm45_vm0, %v129_v3 }
  0xdd   :  { %v124_v6 = vpop.f32.mrb[0].mxu0 }
  0xde   :  { %v95_v7 = vadd.f32 %v124_v6, %v24_v4  ;;  %v86_v8 = vpop.f32.mrb[1].mxu0 }
  0xdf   :  { %v87_v10 = vadd.f32 %v86_v8, %v22_v5  ;;  %v125_v11 = vpop.f32.mrb[2].mxu0 }
  0xe0   :  { %103 = vst.msk [vmem:[%s187_s3 + $0x10] sm:$0xf] %vm102_vm1, %v95_v7  ;;  %v89_v12 = vpop.f32.mrb[3].mxu0 }
  0xe1   :  { %100 = vst.msk [vmem:[%s187_s3] sm:$0xff] %vm45_vm0, %v87_v10  ;;  %v90_v13 = vadd.f32 %v89_v12, %v23_v9 }
  0xe3   :  { %101 = vst.msk [vmem:[%s187_s3 + $0x8] sm:$0xff] %vm45_vm0, %v90_v13 }

// kernel: _lambda_.24
= control target key start
LH: loop header
LB: loop body
LE: loop exit
PB: predicated region body
PF: predicated region fallthrough
CT: control target
= control target key end

     0   :  { %s935_s15 = smov 0   ;;  %s1033_s0 = inlined_call_operand.vmem [shape: bf16[4,4,5,8], index: 0, kind: input, shape index: {}]   ;;  %s1034_s1 = inlined_call_operand.vmem [shape: bf16[4,4,5,8], index: 1, kind: input, shape index: {}]   ;;  %s1035_s2 = inlined_call_operand.vmem [shape: bf16[4,4,5,8], index: 2, kind: input, shape index: {}]   ;;  %s1036_s3 = inlined_call_operand.vmem [shape: f32[5,5], index: 3, kind: input, shape index: {}]   ;;  %s1037_s4 = inlined_call_operand.vmem [shape: bf16[4,4,5,8], index: 4, kind: output, shape index: {}]  }
   0x1 LB: > { %s781_s16 = sadd.s32 4294967295, %s905_s15   ;;  %p785_p0 = scmp.ge.s32.totalorder %s905_s15, 1  ;;  %s905_s15 = sphi %s935_s15, %s14_s15  }
   0x2   : > { %p182_p1 = scmp.lt.s32.totalorder %s905_s15, 5 }
   0x4   : > { %p183_p2 = pnand %p785_p0, %p182_p1 }
   0x5   : > { %p218_p3 = scmp.lt.s32.totalorder (!%p183_p2), %s781_s16, 3  ;;  %v907_v0 = vmov (!%p183_p2), 0.0   ;;  %vm908_vm0 = vmmov (!%p183_p2), 0   ;;  %vm251_vm1 = vcmask (!%p183_p2), 64512   ;;  %v440_v15 = vld [vmem:[%s1036_s3] sm:$0x1f] (!%p183_p2) }
   0x6   : > { %186 = sbr.rel (%p183_p2) target bundleno = 785 (0x311), region = 36  ;;  %824 = vmatprep.subr.bf16.mxu0 (!%p183_p2), %v907_v0  ;;  %830 = vmatprep.subr.bf16.mxu1 (!%p183_p2), %v907_v0  ;;  %vm445_vm2 = vcmask (!%p183_p2), 36864   ;;  %vm498_vm3 = vcmask (!%p183_p2), 1041408   ;;  %vm499_vm4 = vcmask (!%p183_p2), 1042432   ;;  %v909_v62 = vmov (!%p183_p2), 65535  }
   0x7   : > { %826 = vmatprep.mubr.msk.bf16.mxu0 (!%p183_p2), %vm908_vm0, %v907_v0  ;;  %832 = vmatprep.mubr.msk.bf16.mxu1 (!%p183_p2), %vm908_vm0, %v907_v0  ;;  %v500_v63 = vsel (!%p183_p2), %vm498_vm3, 4294967295, %v909_v62  ;;  %vm494_vm5 = vcmask (!%p183_p2), 39936   ;;  %vm687_vm6 = vcmask (!%p183_p2), 59392   ;;  %vm688_vm7 = vsmask.f32 (!%p183_p2), 2304 }
   0x8   : > { %vm1010_vm8 = vmand (!%p183_p2), %vm687_vm6, %vm688_vm7 }
   0xd   : > { %s1041_s16 = smov (!%p218_p3, %s781_s16), 3 }
   0xe   : > { %s949_s17 = sshll.u32 %s1041_s16, 4 }
   0xf   : > { %s227_s20 = scalar_lea.vmem %s1034_s1, %s949_s17  ;;  %s222_s23 = scalar_lea.vmem %s1033_s0, %s949_s17 }
  0x10   : > { %v243_v1 = vld [vmem:[%s227_s20] sm:$0x7]  ;;  %v244_v2 = vld [vmem:[%s227_s20 + $0x4] sm:$0x7]  ;;  %v245_v5 = vld [vmem:[%s227_s20 + $0x8] sm:$0x7]  ;;  %s232_s28 = scalar_lea.vmem %s1035_s2, %s949_s17  ;;  %s1008_s5 = scalar_lea.vmem %s1037_s4, %s949_s17 }
  0x11   : > { %v256_v3 = vsel %vm251_vm1, %v243_v1, 0  ;;  %v302_v4 = vsel %vm251_vm1, %v244_v2, 0  ;;  %v246_v6 = vld [vmem:[%s227_s20 + $0xc] sm:$0x7]  ;;  %v239_v7 = vld [vmem:[%s222_s23] sm:$0x7] }
  0x12   : > { %825 = vmatpush3.bf16.xpose.msra.mxu0 %v256_v3  ;;  %831 = vmatpush3.bf16.xpose.msra.mxu1 %v302_v4  ;;  %v240_v8 = vld [vmem:[%s222_s23 + $0x4] sm:$0x7]  ;;  %v348_v9 = vsel %vm251_vm1, %v245_v5, 0  ;;  %v394_v10 = vsel %vm251_vm1, %v246_v6, 0  ;;  %v241_v11 = vld [vmem:[%s222_s23 + $0x8] sm:$0x7] }
  0x13   : > { %836 = vmatprep.subr.bf16.mxu0 %v907_v0  ;;  %842 = vmatprep.subr.bf16.mxu1 %v907_v0  ;;  %v242_v12 = vld [vmem:[%s222_s23 + $0xc] sm:$0x7]  ;;  %v247_v1 = vld [vmem:[%s232_s28] sm:$0x7]  ;;  %v501_v2 = vsel %vm499_vm4, %v500_v63, 0 }
  0x14   : > { %v503_v3 = vand.u32 %v501_v2, %v247_v1  ;;  %v248_v4 = vld [vmem:[%s232_s28 + $0x4] sm:$0x7]  ;;  %v249_v6 = vld [vmem:[%s232_s28 + $0x8] sm:$0x7] }
  0x15   : > { %v549_v5 = vand.u32 %v501_v2, %v248_v4 }
  0x19   : > { %827 = vmatmul.mubr.msk.bf16.vlgmr.msra.gmra.mrb[0].mxu0 %vm251_vm1, %v239_v7  ;;  %833 = vmatmul.mubr.msk.bf16.vlgmr.msra.gmra.mrb[0].mxu1 %vm251_vm1, %v240_v8  ;;  %v595_v7 = vand.u32 %v501_v2, %v249_v6  ;;  %v250_v8 = vld [vmem:[%s232_s28 + $0xc] sm:$0x7] }
  0x1a   : > { %837 = vmatpush3.bf16.xpose.msra.mxu0 %v348_v9  ;;  %843 = vmatpush3.bf16.xpose.msra.mxu1 %v394_v10  ;;  %v641_v9 = vand.u32 %v501_v2, %v250_v8 }
  0x1b   : > { %838 = vmatprep.mubr.msk.bf16.mxu0 %vm908_vm0, %v907_v0  ;;  %844 = vmatprep.mubr.msk.bf16.mxu1 %vm908_vm0, %v907_v0 }
  0x1c   : > { %848 = vmatprep.subr.bf16.mxu0 %v907_v0  ;;  %854 = vmatprep.subr.bf16.mxu1 %v907_v0 }
  0x21   : > { %839 = vmatmul.mubr.msk.bf16.vlgmr.msra.gmra.mrb[4].mxu0 %vm251_vm1, %v241_v11  ;;  %845 = vmatmul.mubr.msk.bf16.vlgmr.msra.gmra.mrb[4].mxu1 %vm251_vm1, %v242_v12 }
  0x22   : > { %850 = vmatprep.mubr.msk.bf16.mxu0 %vm908_vm0, %v907_v0  ;;  %856 = vmatprep.mubr.msk.bf16.mxu1 %vm908_vm0, %v907_v0 }
  0x23   : > { %849 = vmatpush3.bf16.msra.mxu0 %v503_v3  ;;  %855 = vmatpush3.bf16.msra.mxu1 %v549_v5 }
  0x24   : > { %860 = vmatprep.subr.bf16.mxu0 %v907_v0  ;;  %866 = vmatprep.subr.bf16.mxu1 %v907_v0 }
  0xec   : > { %v292_v13 = vpop.f32.mrb[0].mxu0  ;;  %v338_v14 = vpop.f32.mrb[0].mxu1 }
  0xed   : > { %v436_v16 = vmul.f32 0.35355338, %v292_v13  ;;  %v828_v17 = vpop.f32.mrb[1].mxu0  ;;  %v437_v18 = vmul.f32 0.35355338, %v338_v14  ;;  %v834_v19 = vpop.f32.mrb[1].mxu1 }
  0xee   : > { %v295_v20 = vpop.f32.mrb[2].mxu0  ;;  %v341_v21 = vpop.f32.mrb[2].mxu1 }
  0xef   : > { %v829_v22 = vpop.f32.mrb[3].mxu0  ;;  %v835_v23 = vpop.f32.mrb[3].mxu1  ;;  %v441_v24 = vadd.f32 %v440_v15, %v436_v16  ;;  %v442_v25 = vadd.f32 %v440_v15, %v437_v18 }
  0xf1   : > { %v446_v26 = vsel %vm445_vm2, %v441_v24, -inf  ;;  %v449_v27 = vsel %vm445_vm2, %v442_v25, -inf }
  0xf2   : > { %447 = vmax.xlane.f32.xlu0 %v446_v26 }
  0xf4   : > { %v384_v28 = vpop.f32.mrb[4].mxu0  ;;  %v430_v29 = vpop.f32.mrb[4].mxu1 }
  0xf5   : > { %v438_v30 = vmul.f32 0.35355338, %v384_v28  ;;  %v840_v31 = vpop.f32.mrb[5].mxu0  ;;  %v439_v32 = vmul.f32 0.35355338, %v430_v29  ;;  %v846_v33 = vpop.f32.mrb[5].mxu1 }
  0xf6   : > { %450 = vmax.xlane.f32.xlu0 %v449_v27  ;;  %v387_v34 = vpop.f32.mrb[6].mxu0  ;;  %v433_v35 = vpop.f32.mrb[6].mxu1  ;;  %v690_v27 = vld [vmem:[%s1008_s5] sm:$0x7] }
  0xf7   : > { %v841_v36 = vpop.f32.mrb[7].mxu0  ;;  %v847_v37 = vpop.f32.mrb[7].mxu1  ;;  %v443_v38 = vadd.f32 %v440_v15, %v438_v30  ;;  %v444_v39 = vadd.f32 %v440_v15, %v439_v32  ;;  %v693_v34 = vld [vmem:[%s1008_s5 + $0x4] sm:$0x7] }
  0xf9   : > { %v452_v40 = vsel %vm445_vm2, %v443_v38, -inf  ;;  %v455_v41 = vsel %vm445_vm2, %v444_v39, -inf }
  0xfa   : > { %453 = vmax.xlane.f32.xlu1 %v452_v40 }
  0xfe   : > { %456 = vmax.xlane.f32.xlu1 %v455_v41  ;;  %v696_v41 = vld [vmem:[%s1008_s5 + $0x8] sm:$0x7] }
 0x17f   : > { %v448_v42 = vpop.xlane.xlu0 %447 }
 0x180   : > { %v458_v43 = vsub.f32 %v441_v24, %v448_v42 }
 0x182   : > { %v462_v44 = vmul.f32 1.442695, %v458_v43 }
 0x183   : > { %v451_v45 = vpop.xlane.xlu0 %450 }
 0x184   : > { %883 = vpow2.f32 %v462_v44  ;;  %v459_v46 = vsub.f32 %v442_v25, %v451_v45 }
 0x186   : > { %v464_v47 = vmul.f32 1.442695, %v459_v46 }
 0x187   : > { %v454_v48 = vpop.xlane.xlu1 %453 }
 0x188   : > { %885 = vpow2.f32 %v464_v47  ;;  %v460_v49 = vsub.f32 %v443_v38, %v454_v48  ;;  %v699_v48 = vld [vmem:[%s1008_s5 + $0xc] sm:$0x7] }
 0x18a   : > { %v466_v50 = vmul.f32 1.442695, %v460_v49 }
 0x18b   : > { %v457_v51 = vpop.xlane.xlu1 %456 }
 0x18c   : > { %887 = vpow2.f32 %v466_v50  ;;  %v461_v52 = vsub.f32 %v444_v39, %v457_v51 }
 0x18e   : > { %v884_v53 = vpop.eup %883  ;;  %v468_v54 = vmul.f32 1.442695, %v461_v52 }
 0x18f   : > { %v470_v55 = vsel %vm445_vm2, %v884_v53, 0.0 }
 0x190   : > { %889 = vpow2.f32 %v468_v54  ;;  %471 = vadd.xlane.f32.xlu0 %v470_v55 }
 0x192   : > { %v886_v56 = vpop.eup %885 }
 0x193   : > { %v473_v57 = vsel %vm445_vm2, %v886_v56, 0.0 }
 0x194   : > { %474 = vadd.xlane.f32.xlu1 %v473_v57 }
 0x196   : > { %v888_v58 = vpop.eup %887 }
 0x197   : > { %v476_v59 = vsel %vm445_vm2, %v888_v58, 0.0 }
 0x198   : > { %477 = vadd.xlane.f32.xlu0 %v476_v59 }
 0x19a   : > { %v890_v60 = vpop.eup %889 }
 0x19b   : > { %v479_v61 = vsel %vm445_vm2, %v890_v60, 0.0 }
 0x19c   : > { %480 = vadd.xlane.f32.xlu1 %v479_v61 }
 0x21d   : > { %v472_v10 = vpop.xlane.xlu0 %471 }
 0x21e   : > { %891 = vrcp.f32 %v472_v10 }
 0x221   : > { %v475_v11 = vpop.xlane.xlu1 %474 }
 0x222   : > { %893 = vrcp.f32 %v475_v11 }
 0x225   : > { %v478_v12 = vpop.xlane.xlu0 %477 }
 0x226   : > { %895 = vrcp.f32 %v478_v12 }
 0x228   : > { %v892_v13 = vpop.eup %891 }
 0x229   : > { %v483_v14 = vmul.f32 %v892_v13, %v884_v53  ;;  %v481_v15 = vpop.xlane.xlu1 %480 }
 0x22a   : > { %897 = vrcp.f32 %v481_v15 }
 0x22b   : > { %v490_v16 = vpack.c.bf16 %v483_v14, %v483_v14 }
 0x22c   : > { %v894_v17 = vpop.eup %893 }
 0x22d   : > { %v485_v18 = vmul.f32 %v894_v17, %v886_v56  ;;  %851 = vmatmul.mubr.msk.bf16.vlgmr.msra.gmra.mrb[8].mxu0 %vm494_vm5, %v490_v16 }
 0x22e   : > { %861 = vmatpush3.bf16.msra.mxu0 %v595_v7  ;;  %862 = vmatprep.mubr.msk.bf16.mxu0 %vm908_vm0, %v907_v0 }
 0x22f   : > { %v491_v19 = vpack.c.bf16 %v485_v18, %v485_v18 }
 0x230   : > { %v896_v20 = vpop.eup %895 }
 0x231   : > { %v487_v21 = vmul.f32 %v896_v20, %v888_v58  ;;  %857 = vmatmul.mubr.msk.bf16.vlgmr.msra.gmra.mrb[8].mxu1 %vm494_vm5, %v491_v19 }
 0x232   : > { %867 = vmatpush3.bf16.msra.mxu1 %v641_v9  ;;  %868 = vmatprep.mubr.msk.bf16.mxu1 %vm908_vm0, %v907_v0 }
 0x233   : > { %v492_v22 = vpack.c.bf16 %v487_v21, %v487_v21 }
 0x234   : > { %v898_v23 = vpop.eup %897 }
 0x235   : > { %v489_v24 = vmul.f32 %v898_v23, %v890_v60  ;;  %863 = vmatmul.mubr.msk.bf16.vlgmr.msra.gmra.mrb[12].mxu0 %vm494_vm5, %v492_v22 }
 0x237   : > { %v493_v25 = vpack.c.bf16 %v489_v24, %v489_v24 }
 0x239   : > { %869 = vmatmul.mubr.msk.bf16.vlgmr.msra.gmra.mrb[12].mxu1 %vm494_vm5, %v493_v25 }
 0x300   : > { %v539_v26 = vpop.f32.mrb[8].mxu0 }
 0x301   : > { %v683_v28 = vpack.c.bf16 %v539_v26, %v539_v26  ;;  %v852_v29 = vpop.f32.mrb[9].mxu0 }
 0x302   : > { %v542_v30 = vpop.f32.mrb[10].mxu0 }
 0x303   : > { %v691_v31 = vsel %vm1010_vm8, %v683_v28, %v690_v27  ;;  %v853_v32 = vpop.f32.mrb[11].mxu0 }
 0x304   : > { %692 = vst [vmem:[%s1008_s5] sm:$0x7] %v691_v31  ;;  %v585_v33 = vpop.f32.mrb[8].mxu1 }
 0x305   : > { %v684_v35 = vpack.c.bf16 %v585_v33, %v585_v33  ;;  %v858_v36 = vpop.f32.mrb[9].mxu1 }
 0x306   : > { %v588_v37 = vpop.f32.mrb[10].mxu1 }
 0x307   : > { %v694_v38 = vsel %vm1010_vm8, %v684_v35, %v693_v34  ;;  %v859_v39 = vpop.f32.mrb[11].mxu1 }
 0x308   : > { %695 = vst [vmem:[%s1008_s5 + $0x4] sm:$0x7] %v694_v38  ;;  %v631_v40 = vpop.f32.mrb[12].mxu0 }
 0x309   : > { %v685_v42 = vpack.c.bf16 %v631_v40, %v631_v40  ;;  %v864_v43 = vpop.f32.mrb[13].mxu0 }
 0x30a   : > { %v634_v44 = vpop.f32.mrb[14].mxu0 }
 0x30b   : > { %v697_v45 = vsel %vm1010_vm8, %v685_v42, %v696_v41  ;;  %v865_v46 = vpop.f32.mrb[15].mxu0 }
 0x30c   : > { %698 = vst [vmem:[%s1008_s5 + $0x8] sm:$0x7] %v697_v45  ;;  %v677_v47 = vpop.f32.mrb[12].mxu1 }
 0x30d   : > { %v686_v49 = vpack.c.bf16 %v677_v47, %v677_v47  ;;  %v870_v50 = vpop.f32.mrb[13].mxu1 }
 0x30e   : > { %v680_v51 = vpop.f32.mrb[14].mxu1 }
 0x30f   : > { %v700_v52 = vsel %vm1010_vm8, %v686_v49, %v699_v48  ;;  %v871_v53 = vpop.f32.mrb[15].mxu1 }
 0x310   : > { %701 = vst [vmem:[%s1008_s5 + $0xc] sm:$0x7] %v700_v52 }
 0x311 PF: > { %s14_s15 = sadd.s32 1, %s905_s15  }
 0x312   : > { %p11_p4 = scmp.ge.s32.totalorder %s14_s15, 6  }
 0x314   :  { %13 = sbr.rel (!%p11_p4) target bundleno = 1 (0x1), region = 72 }

// kernel: _lambda_.27
= control target key start
LH: loop header
LB: loop body
LE: loop exit
PB: predicated region body
PF: predicated region fallthrough
CT: control target
= control target key end

     0   :  { %vm61_vm0 = vcmask 523264   ;;  %vm119_vm1 = vcmask 257024   ;;  %vm116_vm2 = vcmask 261120   ;;  %s213_s1 = inlined_call_operand.vmem [shape: bf16[64,32], index: 1, kind: input, shape index: {}]   ;;  %s214_s0 = inlined_call_operand.vmem [shape: bf16[20,64], index: 0, kind: input, shape index: {}]   ;;  %s215_s2 = inlined_call_operand.vmem [shape: f32[20,32], index: 2, kind: input, shape index: {}]   ;;  %s216_s3 = inlined_call_operand.vmem [shape: f32[20,32], index: 3, kind: output, shape index: {}]  }
   0x1   :  { %v151_v0 = vld [vmem:[%s213_s1] sm:$0xff]   ;;  %v152_v1 = vld [vmem:[%s213_s1 + $0x8] sm:$0xff]   ;;  %v153_v2 = vld [vmem:[%s213_s1 + $0x10] sm:$0xff]  }
   0x2   :  { %139 = vmatprep.subr.bf16.mxu0 %v151_v0  ;;  %v155_v3 = vld [vmem:[%s214_s0] sm:$0xff]   ;;  %v154_v4 = vld [vmem:[%s213_s1 + $0x18] sm:$0xff]   ;;  %v156_v5 = vld [vmem:[%s214_s0 + $0x8] ss:$0 sps:$4 sm:$0x33]  }
   0x3   :  { %140 = vmatpush3.bf16.msra.mxu0 %v151_v0  ;;  %147 = vmatprep.mubr.msk.bf16.mxu0 %vm61_vm0, %v155_v3  ;;  %v28_v6 = vld [vmem:[%s215_s2 + $0x10] sm:$0xf]  ;;  %v26_v7 = vld [vmem:[%s215_s2] sm:$0xff]  ;;  %v27_v11 = vld [vmem:[%s215_s2 + $0x8] sm:$0xff] }
   0x4   :  { %141 = vmatprep.subr.bf16.mxu0 %v152_v1 }
   0x7   :  { %142 = vmatpush3.bf16.msra.mxu0 %v152_v1 }
   0x8   :  { %143 = vmatprep.subr.bf16.mxu0 %v153_v2 }
   0xb   :  { %144 = vmatpush3.bf16.msra.mxu0 %v153_v2 }
   0xc   :  { %145 = vmatprep.subr.bf16.mxu0 %v154_v4 }
   0xf   :  { %146 = vmatpush3.bf16.msra.mxu0 %v154_v4 }
  0x12   :  { %148 = vmatmul.mubr.msk.bf16.vlgmr.msra.gmra.mrb[0].mxu0 %vm61_vm0, %v156_v5 }
  0xe5   :  { %v149_v8 = vpop.f32.mrb[0].mxu0 }
  0xe6   :  { %v111_v9 = vadd.f32 %v149_v8, %v28_v6  ;;  %v102_v10 = vpop.f32.mrb[1].mxu0 }
  0xe7   :  { %v103_v12 = vadd.f32 %v102_v10, %v26_v7  ;;  %v150_v13 = vpop.f32.mrb[2].mxu0 }
  0xe8   :  { %120 = vst.msk [vmem:[%s216_s3 + $0x10] sm:$0xf] %vm119_vm1, %v111_v9  ;;  %v105_v14 = vpop.f32.mrb[3].mxu0 }
  0xe9   :  { %117 = vst.msk [vmem:[%s216_s3] sm:$0xff] %vm116_vm2, %v103_v12  ;;  %v106_v15 = vadd.f32 %v105_v14, %v27_v11 }
  0xeb   :  { %118 = vst.msk [vmem:[%s216_s3 + $0x8] sm:$0xff] %vm116_vm2, %v106_v15 }

// kernel: _lambda_.26
= control target key start
LH: loop header
LB: loop body
LE: loop exit
PB: predicated region body
PF: predicated region fallthrough
CT: control target
= control target key end

     0   :  { %vm24_vm0 = vcmask 261120   ;;  %vm31_vm1 = vcmask 257024   ;;  %vm228_vm2 = vcmask 517120   ;;  %vm225_vm3 = vcmask 519168   ;;  %s353_s0 = inlined_call_operand.vmem [shape: f32[20,32], index: 0, kind: input, shape index: {}]   ;;  %s354_s2 = inlined_call_operand.vmem [shape: bf16[32,64], index: 2, kind: input, shape index: {}]   ;;  %s355_s3 = inlined_call_operand.vmem [shape: bf16[32,64], index: 3, kind: input, shape index: {}]   ;;  %s356_s1 = inlined_call_operand.vmem [shape: f32[1,32], index: 1, kind: input, shape index: {}]   ;;  %s357_s4 = inlined_call_operand.vmem [shape: bf16[20,64], index: 4, kind: output, shape index: {}]  }
   0x1   :  { %v18_v0 = vld [vmem:[%s353_s0] sm:$0xff]  ;;  %v19_v1 = vld [vmem:[%s353_s0 + $0x8] sm:$0xff]  ;;  %v20_v2 = vld [vmem:[%s353_s0 + $0x10] sm:$0xf] }
   0x2   :  { %v21_v3 = vmul.f32 %v18_v0, %v18_v0  ;;  %v22_v4 = vmul.f32 %v19_v1, %v19_v1  ;;  %v23_v5 = vmul.f32 %v20_v2, %v20_v2  ;;  %v273_v9 = vld [vmem:[%s354_s2] sm:$0xff]   ;;  %v275_v11 = vld [vmem:[%s354_s2 + $0x8] sm:$0xff]  }
   0x3   :  { %v274_v10 = vld [vmem:[%s355_s3] sm:$0xff]   ;;  %257 = vmatprep.subr.bf16.mxu0 %v273_v9  ;;  %v276_v12 = vld [vmem:[%s355_s3 + $0x8] sm:$0xff]  }
   0x4   :  { %v25_v6 = vsel %vm24_vm0, %v21_v3, 0.0  ;;  %v32_v7 = vsel %vm31_vm1, %v23_v5, 0.0  ;;  %v28_v8 = vsel %vm24_vm0, %v22_v4, 0.0  ;;  %265 = vmatprep.subr.bf16.mxu1 %v274_v10  ;;  %258 = vmatpush3.bf16.msra.mxu0 %v273_v9  ;;  %v234_v26 = vld [vmem:[%s356_s1] ss:$0 sm:$0xff] }
   0x5   :  { %26 = vadd.xlane.f32.xlu0 %v25_v6  ;;  %33 = vadd.xlane.f32.xlu1 %v32_v7 }
   0x6   :  { %266 = vmatpush3.bf16.msra.mxu1 %v274_v10  ;;  %259 = vmatprep.subr.bf16.mxu0 %v275_v11 }
   0x7   :  { %267 = vmatprep.subr.bf16.mxu1 %v276_v12 }
   0x8   :  { %260 = vmatpush3.bf16.msra.mxu0 %v275_v11 }
   0x9   :  { %29 = vadd.xlane.f32.xlu0 %v28_v8 }
   0xa   :  { %268 = vmatpush3.bf16.msra.mxu1 %v276_v12 }
  0x92   :  { %v27_v13 = vpop.xlane.xlu0 %26  ;;  %v34_v14 = vpop.xlane.xlu1 %33 }
  0x93   :  { %v36_v15 = vmul.f32 0.03125, %v27_v13  ;;  %v38_v16 = vmul.f32 0.03125, %v34_v14 }
  0x95   :  { %v39_v17 = vadd.f32 1e-05, %v36_v15  ;;  %v41_v18 = vadd.f32 1e-05, %v38_v16 }
  0x96   :  { %v30_v19 = vpop.xlane.xlu0 %29 }
  0x97   :  { %277 = vrsqrt.f32 %v39_v17  ;;  %v37_v20 = vmul.f32 0.03125, %v30_v19 }
  0x98   :  { %279 = vrsqrt.f32 %v41_v18 }
  0x99   :  { %v40_v21 = vadd.f32 1e-05, %v37_v20 }
  0x9b   :  { %281 = vrsqrt.f32 %v40_v21 }
  0xa1   :  { %v278_v22 = vpop.eup %277 }
  0xa2   :  { %v280_v23 = vpop.eup %279  ;;  %v45_v25 = vmul.f32 %v278_v22, %v18_v0 }
  0xa3   :  { %v47_v24 = vmul.f32 %v280_v23, %v20_v2 }
  0xa4   :  { %v55_v30 = vmul.f32 %v234_v26, %v45_v25 }
  0xa5   :  { %v282_v27 = vpop.eup %281  ;;  %v57_v28 = vmul.f32 %v234_v26, %v47_v24 }
  0xa6   :  { %v46_v29 = vmul.f32 %v282_v27, %v19_v1 }
  0xa7   :  { %v59_v32 = vpack.c.bf16 %v57_v28, %v57_v28 }
  0xa8   :  { %v56_v31 = vmul.f32 %v234_v26, %v46_v29 }
  0xaa   :  { %v58_v33 = vpack.c.bf16 %v56_v31, %v55_v30 }
  0xac   :  { %261 = vmatprep.mubr.msk.bf16.mxu0 %vm24_vm0, %v58_v33  ;;  %269 = vmatprep.mubr.msk.bf16.mxu1 %vm24_vm0, %v58_v33 }
  0xad   :  { %262 = vmatmul.mubr.msk.bf16.vlgmr.msra.gmra.mrb[0].mxu0 %vm24_vm0, %v59_v32  ;;  %270 = vmatmul.mubr.msk.bf16.vlgmr.msra.gmra.mrb[0].mxu1 %vm24_vm0, %v59_v32 }
 0x180   :  { %v263_v34 = vpop.f32.mrb[0].mxu0  ;;  %v271_v35 = vpop.f32.mrb[0].mxu1 }
 0x181   :  { %v196_v36 = vmul.f32 0.5, %v263_v34  ;;  %v116_v37 = vpop.f32.mrb[1].mxu0  ;;  %v180_v38 = vpop.f32.mrb[1].mxu1 }
 0x182   :  { %v194_v39 = vmul.f32 0.5, %v116_v37  ;;  %v264_v40 = vpop.f32.mrb[2].mxu0  ;;  %v272_v41 = vpop.f32.mrb[2].mxu1 }
 0x183   :  { %283 = vtanh.f32 %v196_v36  ;;  %v119_v42 = vpop.f32.mrb[3].mxu0  ;;  %v183_v43 = vpop.f32.mrb[3].mxu1 }
 0x184   :  { %285 = vtanh.f32 %v194_v39  ;;  %v195_v44 = vmul.f32 0.5, %v119_v42 }
 0x186   :  { %287 = vtanh.f32 %v195_v44 }
 0x18d   :  { %v284_v45 = vpop.eup %283 }
 0x18e   :  { %v286_v46 = vpop.eup %285  ;;  %v202_v47 = vadd.f32 1.0, %v284_v45 }
 0x18f   :  { %v200_v48 = vadd.f32 1.0, %v286_v46 }
 0x190   :  { %v288_v49 = vpop.eup %287  ;;  %v205_v50 = vmul.f32 0.5, %v202_v47 }
 0x191   :  { %v203_v51 = vmul.f32 0.5, %v200_v48  ;;  %v201_v52 = vadd.f32 1.0, %v288_v49 }
 0x192   :  { %v208_v53 = vmul.f32 %v263_v34, %v205_v50 }
 0x193   :  { %v206_v54 = vmul.f32 %v203_v51, %v116_v37  ;;  %v204_v55 = vmul.f32 0.5, %v201_v52 }
 0x194   :  { %v211_v56 = vmul.f32 %v271_v35, %v208_v53 }
 0x195   :  { %v209_v57 = vmul.f32 %v206_v54, %v180_v38  ;;  %v207_v58 = vmul.f32 %v204_v55, %v119_v42 }
 0x196   :  { %v248_v59 = vpack.c.bf16 %v211_v56, %v211_v56 }
 0x197   :  { %v246_v60 = vpack.c.bf16 %v209_v57, %v209_v57  ;;  %v210_v61 = vmul.f32 %v207_v58, %v183_v43 }
 0x198   :  { %229 = vst.msk [vmem:[%s357_s4 + $0x8] sm:$0x3] %vm228_vm2, %v248_v59 }
 0x199   :  { %226 = vst.msk [vmem:[%s357_s4] sm:$0xf] %vm225_vm3, %v246_v60  ;;  %v247_v62 = vpack.c.bf16 %v210_v61, %v210_v61 }
 0x19b   :  { %227 = vst.msk [vmem:[%s357_s4 + $0x4] sm:$0xf] %vm225_vm3, %v247_v62 }

// kernel: _lambda_.33
= control target key start
LH: loop header
LB: loop body
LE: loop exit
PB: predicated region body
PF: predicated region fallthrough
CT: control target
= control target key end

     0   :  { %vm15_vm0 = vcmask 261120   ;;  %vm48_vm1 = vcmask 257024   ;;  %s94_s0 = inlined_call_operand.vmem [shape: f32[16,32], index: 0, kind: input, shape index: {}]   ;;  %s95_s1 = inlined_call_operand.vmem [shape: f32[1,32], index: 1, kind: input, shape index: {}]   ;;  %s96_s2 = inlined_call_operand.vmem [shape: bf16[16,32], index: 2, kind: output, shape index: {}]  }
   0x1   :  { %v11_v0 = vld [vmem:[%s94_s0] sm:$0xff]  ;;  %v12_v1 = vld [vmem:[%s94_s0 + $0x8] sm:$0xff] }
   0x2   :  { %v13_v2 = vmul.f32 %v11_v0, %v11_v0  ;;  %v14_v3 = vmul.f32 %v12_v1, %v12_v1  ;;  %v55_v13 = vld [vmem:[%s95_s1] ss:$0 sm:$0xff] }
   0x4   :  { %v16_v4 = vsel %vm15_vm0, %v13_v2, 0.0  ;;  %v19_v5 = vsel %vm15_vm0, %v14_v3, 0.0 }
   0x5   :  { %17 = vadd.xlane.f32.xlu0 %v16_v4 }
   0x9   :  { %20 = vadd.xlane.f32.xlu0 %v19_v5 }
  0x92   :  { %v18_v6 = vpop.xlane.xlu0 %17 }
  0x93   :  { %v23_v7 = vmul.f32 0.03125, %v18_v6 }
  0x95   :  { %v25_v8 = vadd.f32 1e-05, %v23_v7 }
  0x96   :  { %v21_v9 = vpop.xlane.xlu0 %20 }
  0x97   :  { %60 = vrsqrt.f32 %v25_v8  ;;  %v24_v10 = vmul.f32 0.03125, %v21_v9 }
  0x99   :  { %v26_v11 = vadd.f32 1e-05, %v24_v10 }
  0x9b   :  { %62 = vrsqrt.f32 %v26_v11 }
  0xa1   :  { %v61_v12 = vpop.eup %60 }
  0xa2   :  { %v29_v14 = vmul.f32 %v61_v12, %v11_v0 }
  0xa4   :  { %v38_v15 = vmul.f32 %v55_v13, %v29_v14 }
  0xa5   :  { %v63_v16 = vpop.eup %62 }
  0xa6   :  { %v58_v17 = vpack.c.bf16 %v38_v15, %v38_v15  ;;  %v30_v18 = vmul.f32 %v63_v16, %v12_v1 }
  0xa8   :  { %49 = vst.msk [vmem:[%s96_s2] sm:$0xf] %vm48_vm1, %v58_v17  ;;  %v39_v19 = vmul.f32 %v55_v13, %v30_v18 }
  0xaa   :  { %v59_v20 = vpack.c.bf16 %v39_v19, %v39_v19 }
  0xac   :  { %50 = vst.msk [vmem:[%s96_s2 + $0x4] sm:$0xf] %vm48_vm1, %v59_v20 }

// kernel: _lambda_.34
= control target key start
LH: loop header
LB: loop body
LE: loop exit
PB: predicated region body
PF: predicated region fallthrough
CT: control target
= control target key end

     0   :  { %v170_v0 = vmov 0.0   ;;  %vm171_vm0 = vmmov 0   ;;  %vm117_vm1 = vcmask 257024   ;;  %s217_s1 = inlined_call_operand.vmem [shape: bf16[128,32], index: 1, kind: input, shape index: {}]   ;;  %s218_s0 = inlined_call_operand.vmem [shape: bf16[4,128], index: 0, kind: input, shape index: {}]   ;;  %s219_s2 = inlined_call_operand.vmem [shape: f32[4,32], index: 2, kind: output, shape index: {}]  }
   0x1   :  { %140 = vmatprep.subr.bf16.mxu0 %v170_v0  ;;  %v162_v1 = vld [vmem:[%s217_s1] sm:$0xff]   ;;  %156 = vmatprep.mubr.msk.bf16.mxu0 %vm171_vm0, %v170_v0  ;;  %v163_v2 = vld [vmem:[%s217_s1 + $0x8] sm:$0xff]   ;;  %v164_v3 = vld [vmem:[%s217_s1 + $0x10] sm:$0xff]  }
   0x2   :  { %141 = vmatpush3.bf16.msra.mxu0 %v162_v1  ;;  %v165_v4 = vld [vmem:[%s217_s1 + $0x18] sm:$0xff]   ;;  %v166_v5 = vld [vmem:[%s217_s1 + $0x20] sm:$0xff]   ;;  %v167_v6 = vld [vmem:[%s217_s1 + $0x28] sm:$0xff]  }
   0x3   :  { %142 = vmatprep.subr.bf16.mxu0 %v170_v0  ;;  %v168_v7 = vld [vmem:[%s217_s1 + $0x30] sm:$0xff]   ;;  %v169_v8 = vld [vmem:[%s217_s1 + $0x38] sm:$0xff]   ;;  %v12_v9 = vld [vmem:[%s218_s0] sm:$0x3] }
   0x6   :  { %143 = vmatpush3.bf16.msra.mxu0 %v163_v2 }
   0x7   :  { %144 = vmatprep.subr.bf16.mxu0 %v170_v0 }
   0xa   :  { %145 = vmatpush3.bf16.msra.mxu0 %v164_v3 }
   0xb   :  { %146 = vmatprep.subr.bf16.mxu0 %v170_v0 }
   0xe   :  { %147 = vmatpush3.bf16.msra.mxu0 %v165_v4 }
   0xf   :  { %148 = vmatprep.subr.bf16.mxu0 %v170_v0 }
  0x12   :  { %149 = vmatpush3.bf16.msra.mxu0 %v166_v5 }
  0x13   :  { %150 = vmatprep.subr.bf16.mxu0 %v170_v0 }
  0x16   :  { %151 = vmatpush3.bf16.msra.mxu0 %v167_v6 }
  0x17   :  { %152 = vmatprep.subr.bf16.mxu0 %v170_v0 }
  0x1a   :  { %153 = vmatpush3.bf16.msra.mxu0 %v168_v7 }
  0x1b   :  { %154 = vmatprep.subr.bf16.mxu0 %v170_v0 }
  0x1e   :  { %155 = vmatpush3.bf16.msra.mxu0 %v169_v8 }
  0x21   :  { %157 = vmatmul.mubr.bf16.vlgmr.msra.gmra.mrb[0].mxu0 %v12_v9 }
  0xf4   :  { %v111_v10 = vpop.f32.mrb[0].mxu0 }
  0xf5   :  { %118 = vst.msk [vmem:[%s219_s2] sm:$0xf] %vm117_vm1, %v111_v10  ;;  %v158_v11 = vpop.f32.mrb[1].mxu0 }
  0xf6   :  { %v114_v12 = vpop.f32.mrb[2].mxu0 }
  0xf7   :  { %v159_v13 = vpop.f32.mrb[3].mxu0 }

// kernel: _lambda_.35
= control target key start
LH: loop header
LB: loop body
LE: loop exit
PB: predicated region body
PF: predicated region fallthrough
CT: control target
= control target key end

     0   :  { %vm21_vm0 = vcmask 261120   ;;  %vm28_vm1 = vcmask 259072   ;;  %vm143_vm2 = vcmask 780288   ;;  %vm140_vm3 = vcmask 781312   ;;  %s231_s0 = inlined_call_operand.vmem [shape: f32[22,32], index: 0, kind: input, shape index: {}]   ;;  %s232_s2 = inlined_call_operand.vmem [shape: bf16[32,96], index: 2, kind: input, shape index: {}]   ;;  %s233_s1 = inlined_call_operand.vmem [shape: f32[1,32], index: 1, kind: input, shape index: {}]   ;;  %s234_s3 = inlined_call_operand.vmem [shape: bf16[22,96], index: 3, kind: output, shape index: {}]  }
   0x1   :  { %v15_v0 = vld [vmem:[%s231_s0] sm:$0xff]  ;;  %v16_v1 = vld [vmem:[%s231_s0 + $0x8] sm:$0xff]  ;;  %v17_v2 = vld [vmem:[%s231_s0 + $0x10] sm:$0x3f] }
   0x2   :  { %v18_v3 = vmul.f32 %v15_v0, %v15_v0  ;;  %v19_v4 = vmul.f32 %v16_v1, %v16_v1  ;;  %v20_v5 = vmul.f32 %v17_v2, %v17_v2  ;;  %v172_v9 = vld [vmem:[%s232_s2] sm:$0xff]   ;;  %v173_v10 = vld [vmem:[%s232_s2 + $0x8] sm:$0xff]  }
   0x3   :  { %164 = vmatprep.subr.bf16.mxu0 %v172_v9  ;;  %v149_v24 = vld [vmem:[%s233_s1] ss:$0 sm:$0xff] }
   0x4   :  { %v22_v6 = vsel %vm21_vm0, %v18_v3, 0.0  ;;  %v29_v7 = vsel %vm28_vm1, %v20_v5, 0.0  ;;  %v25_v8 = vsel %vm21_vm0, %v19_v4, 0.0  ;;  %165 = vmatpush3.bf16.msra.mxu0 %v172_v9 }
   0x5   :  { %23 = vadd.xlane.f32.xlu0 %v22_v6  ;;  %30 = vadd.xlane.f32.xlu1 %v29_v7 }
   0x6   :  { %166 = vmatprep.subr.bf16.mxu0 %v173_v10 }
   0x8   :  { %167 = vmatpush3.bf16.msra.mxu0 %v173_v10 }
   0x9   :  { %26 = vadd.xlane.f32.xlu0 %v25_v8 }
  0x92   :  { %v24_v11 = vpop.xlane.xlu0 %23  ;;  %v31_v12 = vpop.xlane.xlu1 %30 }
  0x93   :  { %v33_v13 = vmul.f32 0.03125, %v24_v11  ;;  %v35_v14 = vmul.f32 0.03125, %v31_v12 }
  0x95   :  { %v36_v15 = vadd.f32 1e-05, %v33_v13  ;;  %v38_v16 = vadd.f32 1e-05, %v35_v14 }
  0x96   :  { %v27_v17 = vpop.xlane.xlu0 %26 }
  0x97   :  { %174 = vrsqrt.f32 %v36_v15  ;;  %v34_v18 = vmul.f32 0.03125, %v27_v17 }
  0x98   :  { %176 = vrsqrt.f32 %v38_v16 }
  0x99   :  { %v37_v19 = vadd.f32 1e-05, %v34_v18 }
  0x9b   :  { %178 = vrsqrt.f32 %v37_v19 }
  0xa1   :  { %v175_v20 = vpop.eup %174 }
  0xa2   :  { %v177_v21 = vpop.eup %176  ;;  %v42_v23 = vmul.f32 %v175_v20, %v15_v0 }
  0xa3   :  { %v44_v22 = vmul.f32 %v177_v21, %v17_v2 }
  0xa4   :  { %v52_v28 = vmul.f32 %v149_v24, %v42_v23 }
  0xa5   :  { %v179_v25 = vpop.eup %178  ;;  %v54_v26 = vmul.f32 %v149_v24, %v44_v22 }
  0xa6   :  { %v43_v27 = vmul.f32 %v179_v25, %v16_v1 }
  0xa7   :  { %v56_v30 = vpack.c.bf16 %v54_v26, %v54_v26 }
  0xa8   :  { %v53_v29 = vmul.f32 %v149_v24, %v43_v27 }
  0xaa   :  { %v55_v31 = vpack.c.bf16 %v53_v29, %v52_v28 }
  0xac   :  { %168 = vmatprep.mubr.msk.bf16.mxu0 %vm21_vm0, %v55_v31 }
  0xad   :  { %169 = vmatmul.mubr.msk.bf16.vlgmr.msra.gmra.mrb[0].mxu0 %vm21_vm0, %v56_v30 }
 0x180   :  { %v170_v32 = vpop.f32.mrb[0].mxu0 }
 0x181   :  { %v159_v33 = vpack.c.bf16 %v170_v32, %v170_v32  ;;  %v113_v34 = vpop.f32.mrb[1].mxu0 }
 0x182   :  { %v157_v35 = vpack.c.bf16 %v113_v34, %v113_v34  ;;  %v171_v36 = vpop.f32.mrb[2].mxu0 }
 0x183   :  { %144 = vst.msk [vmem:[%s234_s3 + $0x8] sm:$0x7] %vm143_vm2, %v159_v33  ;;  %v116_v37 = vpop.f32.mrb[3].mxu0 }
 0x184   :  { %141 = vst.msk [vmem:[%s234_s3] sm:$0xf] %vm140_vm3, %v157_v35  ;;  %v158_v38 = vpack.c.bf16 %v116_v37, %v116_v37 }
 0x186   :  { %142 = vst.msk [vmem:[%s234_s3 + $0x4] sm:$0xf] %vm140_vm3, %v158_v38 }

// kernel: _lambda_.37
= control target key start
LH: loop header
LB: loop body
LE: loop exit
PB: predicated region body
PF: predicated region fallthrough
CT: control target
= control target key end

     0   :  { %vm45_vm0 = vcmask 261120   ;;  %vm102_vm1 = vcmask 259072   ;;  %s184_s1 = inlined_call_operand.vmem [shape: bf16[32,32], index: 1, kind: input, shape index: {}]   ;;  %s185_s0 = inlined_call_operand.vmem [shape: bf16[22,32], index: 0, kind: input, shape index: {}]   ;;  %s186_s2 = inlined_call_operand.vmem [shape: f32[22,32], index: 2, kind: input, shape index: {}]   ;;  %s187_s3 = inlined_call_operand.vmem [shape: f32[22,32], index: 3, kind: output, shape index: {}]  }
   0x1   :  { %v126_v0 = vld [vmem:[%s184_s1] sm:$0xff]   ;;  %v127_v1 = vld [vmem:[%s184_s1 + $0x8] sm:$0xff]   ;;  %v24_v4 = vld [vmem:[%s186_s2 + $0x10] sm:$0x3f] }
   0x2   :  { %118 = vmatprep.subr.bf16.mxu0 %v126_v0  ;;  %v128_v2 = vld [vmem:[%s185_s0] sm:$0xff]   ;;  %v129_v3 = vld [vmem:[%s185_s0 + $0x8] ss:$0 sps:$4 sm:$0x77]  }
   0x3   :  { %119 = vmatpush3.bf16.msra.mxu0 %v126_v0  ;;  %122 = vmatprep.mubr.msk.bf16.mxu0 %vm45_vm0, %v128_v2  ;;  %v22_v5 = vld [vmem:[%s186_s2] sm:$0xff]  ;;  %v23_v9 = vld [vmem:[%s186_s2 + $0x8] sm:$0xff] }
   0x4   :  { %120 = vmatprep.subr.bf16.mxu0 %v127_v1 }
   0x7   :  { %121 = vmatpush3.bf16.msra.mxu0 %v127_v1 }
   0xa   :  { %123 = vmatmul.mubr.msk.bf16.vlgmr.msra.gmra.mrb[0].mxu0 %vm45_vm0, %v129_v3 }
  0xdd   :  { %v124_v6 = vpop.f32.mrb[0].mxu0 }
  0xde   :  { %v95_v7 = vadd.f32 %v124_v6, %v24_v4  ;;  %v86_v8 = vpop.f32.mrb[1].mxu0 }
  0xdf   :  { %v87_v10 = vadd.f32 %v86_v8, %v22_v5  ;;  %v125_v11 = vpop.f32.mrb[2].mxu0 }
  0xe0   :  { %103 = vst.msk [vmem:[%s187_s3 + $0x10] sm:$0x3f] %vm102_vm1, %v95_v7  ;;  %v89_v12 = vpop.f32.mrb[3].mxu0 }
  0xe1   :  { %100 = vst.msk [vmem:[%s187_s3] sm:$0xff] %vm45_vm0, %v87_v10  ;;  %v90_v13 = vadd.f32 %v89_v12, %v23_v9 }
  0xe3   :  { %101 = vst.msk [vmem:[%s187_s3 + $0x8] sm:$0xff] %vm45_vm0, %v90_v13 }

// kernel: _lambda_.38
= control target key start
LH: loop header
LB: loop body
LE: loop exit
PB: predicated region body
PF: predicated region fallthrough
CT: control target
= control target key end

     0   :  { %vm24_vm0 = vcmask 261120   ;;  %vm31_vm1 = vcmask 259072   ;;  %vm228_vm2 = vcmask 518144   ;;  %vm225_vm3 = vcmask 519168   ;;  %s353_s0 = inlined_call_operand.vmem [shape: f32[22,32], index: 0, kind: input, shape index: {}]   ;;  %s354_s2 = inlined_call_operand.vmem [shape: bf16[32,64], index: 2, kind: input, shape index: {}]   ;;  %s355_s3 = inlined_call_operand.vmem [shape: bf16[32,64], index: 3, kind: input, shape index: {}]   ;;  %s356_s1 = inlined_call_operand.vmem [shape: f32[1,32], index: 1, kind: input, shape index: {}]   ;;  %s357_s4 = inlined_call_operand.vmem [shape: bf16[22,64], index: 4, kind: output, shape index: {}]  }
   0x1   :  { %v18_v0 = vld [vmem:[%s353_s0] sm:$0xff]  ;;  %v19_v1 = vld [vmem:[%s353_s0 + $0x8] sm:$0xff]  ;;  %v20_v2 = vld [vmem:[%s353_s0 + $0x10] sm:$0x3f] }
   0x2   :  { %v21_v3 = vmul.f32 %v18_v0, %v18_v0  ;;  %v22_v4 = vmul.f32 %v19_v1, %v19_v1  ;;  %v23_v5 = vmul.f32 %v20_v2, %v20_v2  ;;  %v273_v9 = vld [vmem:[%s354_s2] sm:$0xff]   ;;  %v275_v11 = vld [vmem:[%s354_s2 + $0x8] sm:$0xff]  }
   0x3   :  { %v274_v10 = vld [vmem:[%s355_s3] sm:$0xff]   ;;  %257 = vmatprep.subr.bf16.mxu0 %v273_v9  ;;  %v276_v12 = vld [vmem:[%s355_s3 + $0x8] sm:$0xff]  }
   0x4   :  { %v25_v6 = vsel %vm24_vm0, %v21_v3, 0.0  ;;  %v32_v7 = vsel %vm31_vm1, %v23_v5, 0.0  ;;  %v28_v8 = vsel %vm24_vm0, %v22_v4, 0.0  ;;  %265 = vmatprep.subr.bf16.mxu1 %v274_v10  ;;  %258 = vmatpush3.bf16.msra.mxu0 %v273_v9  ;;  %v234_v26 = vld [vmem:[%s356_s1] ss:$0 sm:$0xff] }
   0x5   :  { %26 = vadd.xlane.f32.xlu0 %v25_v6  ;;  %33 = vadd.xlane.f32.xlu1 %v32_v7 }
   0x6   :  { %266 = vmatpush3.bf16.msra.mxu1 %v274_v10  ;;  %259 = vmatprep.subr.bf16.mxu0 %v275_v11 }
   0x7   :  { %267 = vmatprep.subr.bf16.mxu1 %v276_v12 }
   0x8   :  { %260 = vmatpush3.bf16.msra.mxu0 %v275_v11 }
   0x9   :  { %29 = vadd.xlane.f32.xlu0 %v28_v8 }
   0xa   :  { %268 = vmatpush3.bf16.msra.mxu1 %v276_v12 }
  0x92   :  { %v27_v13 = vpop.xlane.xlu0 %26  ;;  %v34_v14 = vpop.xlane.xlu1 %33 }
  0x93   :  { %v36_v15 = vmul.f32 0.03125, %v27_v13  ;;  %v38_v16 = vmul.f32 0.03125, %v34_v14 }
  0x95   :  { %v39_v17 = vadd.f32 1e-05, %v36_v15  ;;  %v41_v18 = vadd.f32 1e-05, %v38_v16 }
  0x96   :  { %v30_v19 = vpop.xlane.xlu0 %29 }
  0x97   :  { %277 = vrsqrt.f32 %v39_v17  ;;  %v37_v20 = vmul.f32 0.03125, %v30_v19 }
  0x98   :  { %279 = vrsqrt.f32 %v41_v18 }
  0x99   :  { %v40_v21 = vadd.f32 1e-05, %v37_v20 }
  0x9b   :  { %281 = vrsqrt.f32 %v40_v21 }
  0xa1   :  { %v278_v22 = vpop.eup %277 }
  0xa2   :  { %v280_v23 = vpop.eup %279  ;;  %v45_v25 = vmul.f32 %v278_v22, %v18_v0 }
  0xa3   :  { %v47_v24 = vmul.f32 %v280_v23, %v20_v2 }
  0xa4   :  { %v55_v30 = vmul.f32 %v234_v26, %v45_v25 }
  0xa5   :  { %v282_v27 = vpop.eup %281  ;;  %v57_v28 = vmul.f32 %v234_v26, %v47_v24 }
  0xa6   :  { %v46_v29 = vmul.f32 %v282_v27, %v19_v1 }
  0xa7   :  { %v59_v32 = vpack.c.bf16 %v57_v28, %v57_v28 }
  0xa8   :  { %v56_v31 = vmul.f32 %v234_v26, %v46_v29 }
  0xaa   :  { %v58_v33 = vpack.c.bf16 %v56_v31, %v55_v30 }
  0xac   :  { %261 = vmatprep.mubr.msk.bf16.mxu0 %vm24_vm0, %v58_v33  ;;  %269 = vmatprep.mubr.msk.bf16.mxu1 %vm24_vm0, %v58_v33 }
  0xad   :  { %262 = vmatmul.mubr.msk.bf16.vlgmr.msra.gmra.mrb[0].mxu0 %vm24_vm0, %v59_v32  ;;  %270 = vmatmul.mubr.msk.bf16.vlgmr.msra.gmra.mrb[0].mxu1 %vm24_vm0, %v59_v32 }
 0x180   :  { %v263_v34 = vpop.f32.mrb[0].mxu0  ;;  %v271_v35 = vpop.f32.mrb[0].mxu1 }
 0x181   :  { %v196_v36 = vmul.f32 0.5, %v263_v34  ;;  %v116_v37 = vpop.f32.mrb[1].mxu0  ;;  %v180_v38 = vpop.f32.mrb[1].mxu1 }
 0x182   :  { %v194_v39 = vmul.f32 0.5, %v116_v37  ;;  %v264_v40 = vpop.f32.mrb[2].mxu0  ;;  %v272_v41 = vpop.f32.mrb[2].mxu1 }
 0x183   :  { %283 = vtanh.f32 %v196_v36  ;;  %v119_v42 = vpop.f32.mrb[3].mxu0  ;;  %v183_v43 = vpop.f32.mrb[3].mxu1 }
 0x184   :  { %285 = vtanh.f32 %v194_v39  ;;  %v195_v44 = vmul.f32 0.5, %v119_v42 }
 0x186   :  { %287 = vtanh.f32 %v195_v44 }
 0x18d   :  { %v284_v45 = vpop.eup %283 }
 0x18e   :  { %v286_v46 = vpop.eup %285  ;;  %v202_v47 = vadd.f32 1.0, %v284_v45 }
 0x18f   :  { %v200_v48 = vadd.f32 1.0, %v286_v46 }
 0x190   :  { %v288_v49 = vpop.eup %287  ;;  %v205_v50 = vmul.f32 0.5, %v202_v47 }
 0x191   :  { %v203_v51 = vmul.f32 0.5, %v200_v48  ;;  %v201_v52 = vadd.f32 1.0, %v288_v49 }
 0x192   :  { %v208_v53 = vmul.f32 %v263_v34, %v205_v50 }
 0x193   :  { %v206_v54 = vmul.f32 %v203_v51, %v116_v37  ;;  %v204_v55 = vmul.f32 0.5, %v201_v52 }
 0x194   :  { %v211_v56 = vmul.f32 %v271_v35, %v208_v53 }
 0x195   :  { %v209_v57 = vmul.f32 %v206_v54, %v180_v38  ;;  %v207_v58 = vmul.f32 %v204_v55, %v119_v42 }
 0x196   :  { %v248_v59 = vpack.c.bf16 %v211_v56, %v211_v56 }
 0x197   :  { %v246_v60 = vpack.c.bf16 %v209_v57, %v209_v57  ;;  %v210_v61 = vmul.f32 %v207_v58, %v183_v43 }
 0x198   :  { %229 = vst.msk [vmem:[%s357_s4 + $0x8] sm:$0x7] %vm228_vm2, %v248_v59 }
 0x199   :  { %226 = vst.msk [vmem:[%s357_s4] sm:$0xf] %vm225_vm3, %v246_v60  ;;  %v247_v62 = vpack.c.bf16 %v210_v61, %v210_v61 }
 0x19b   :  { %227 = vst.msk [vmem:[%s357_s4 + $0x4] sm:$0xf] %vm225_vm3, %v247_v62 }

// kernel: _lambda_.39
= control target key start
LH: loop header
LB: loop body
LE: loop exit
PB: predicated region body
PF: predicated region fallthrough
CT: control target
= control target key end

     0   :  { %vm61_vm0 = vcmask 523264   ;;  %vm119_vm1 = vcmask 259072   ;;  %vm116_vm2 = vcmask 261120   ;;  %s213_s1 = inlined_call_operand.vmem [shape: bf16[64,32], index: 1, kind: input, shape index: {}]   ;;  %s214_s0 = inlined_call_operand.vmem [shape: bf16[22,64], index: 0, kind: input, shape index: {}]   ;;  %s215_s2 = inlined_call_operand.vmem [shape: f32[22,32], index: 2, kind: input, shape index: {}]   ;;  %s216_s3 = inlined_call_operand.vmem [shape: f32[22,32], index: 3, kind: output, shape index: {}]  }
   0x1   :  { %v151_v0 = vld [vmem:[%s213_s1] sm:$0xff]   ;;  %v152_v1 = vld [vmem:[%s213_s1 + $0x8] sm:$0xff]   ;;  %v153_v2 = vld [vmem:[%s213_s1 + $0x10] sm:$0xff]  }
   0x2   :  { %139 = vmatprep.subr.bf16.mxu0 %v151_v0  ;;  %v155_v3 = vld [vmem:[%s214_s0] sm:$0xff]   ;;  %v154_v4 = vld [vmem:[%s213_s1 + $0x18] sm:$0xff]   ;;  %v156_v5 = vld [vmem:[%s214_s0 + $0x8] ss:$0 sps:$4 sm:$0x77]  }
   0x3   :  { %140 = vmatpush3.bf16.msra.mxu0 %v151_v0  ;;  %147 = vmatprep.mubr.msk.bf16.mxu0 %vm61_vm0, %v155_v3  ;;  %v28_v6 = vld [vmem:[%s215_s2 + $0x10] sm:$0x3f]  ;;  %v26_v7 = vld [vmem:[%s215_s2] sm:$0xff]  ;;  %v27_v11 = vld [vmem:[%s215_s2 + $0x8] sm:$0xff] }
   0x4   :  { %141 = vmatprep.subr.bf16.mxu0 %v152_v1 }
   0x7   :  { %142 = vmatpush3.bf16.msra.mxu0 %v152_v1 }
   0x8   :  { %143 = vmatprep.subr.bf16.mxu0 %v153_v2 }
   0xb   :  { %144 = vmatpush3.bf16.msra.mxu0 %v153_v2 }
   0xc   :  { %145 = vmatprep.subr.bf16.mxu0 %v154_v4 }
   0xf   :  { %146 = vmatpush3.bf16.msra.mxu0 %v154_v4 }
  0x12   :  { %148 = vmatmul.mubr.msk.bf16.vlgmr.msra.gmra.mrb[0].mxu0 %vm61_vm0, %v156_v5 }
  0xe5   :  { %v149_v8 = vpop.f32.mrb[0].mxu0 }
  0xe6   :  { %v111_v9 = vadd.f32 %v149_v8, %v28_v6  ;;  %v102_v10 = vpop.f32.mrb[1].mxu0 }
  0xe7   :  { %v103_v12 = vadd.f32 %v102_v10, %v26_v7  ;;  %v150_v13 = vpop.f32.mrb[2].mxu0 }
  0xe8   :  { %120 = vst.msk [vmem:[%s216_s3 + $0x10] sm:$0x3f] %vm119_vm1, %v111_v9  ;;  %v105_v14 = vpop.f32.mrb[3].mxu0 }
  0xe9   :  { %117 = vst.msk [vmem:[%s216_s3] sm:$0xff] %vm116_vm2, %v103_v12  ;;  %v106_v15 = vadd.f32 %v105_v14, %v27_v11 }
  0xeb   :  { %118 = vst.msk [vmem:[%s216_s3 + $0x8] sm:$0xff] %vm116_vm2, %v106_v15 }

// kernel: _lambda_.36
= control target key start
LH: loop header
LB: loop body
LE: loop exit
PB: predicated region body
PF: predicated region fallthrough
CT: control target
= control target key end

     0   :  { %s1157_s15 = smov 0   ;;  %s1294_s0 = inlined_call_operand.vmem [shape: bf16[2,4,11,8], index: 0, kind: input, shape index: {}]   ;;  %s1295_s1 = inlined_call_operand.vmem [shape: bf16[2,4,11,8], index: 1, kind: input, shape index: {}]   ;;  %s1296_s2 = inlined_call_operand.vmem [shape: bf16[2,4,11,8], index: 2, kind: input, shape index: {}]   ;;  %s1297_s3 = inlined_call_operand.vmem [shape: f32[11,11], index: 3, kind: input, shape index: {}]   ;;  %s1298_s4 = inlined_call_operand.vmem [shape: bf16[2,4,11,8], index: 4, kind: output, shape index: {}]  }
   0x1 LB: > { %s947_s16 = sadd.s32 4294967295, %s1127_s15   ;;  %p951_p0 = scmp.ge.s32.totalorder %s1127_s15, 1  ;;  %s1127_s15 = sphi %s1157_s15, %s14_s15  }
   0x2   : > { %p182_p1 = scmp.lt.s32.totalorder %s1127_s15, 3 }
   0x4   : > { %p183_p2 = pnand %p951_p0, %p182_p1 }
   0x5   : > { %p218_p3 = scmp.lt.s32.totalorder (!%p183_p2), %s947_s16, 1  ;;  %v1129_v0 = vmov (!%p183_p2), 0.0   ;;  %vm1130_vm0 = vmmov (!%p183_p2), 0   ;;  %vm273_vm1 = vcmask (!%p183_p2), 64512   ;;  %v500_v14 = vld [vmem:[%s1297_s3] sm:$0xff] (!%p183_p2)  ;;  %vm510_vm2 = vcmask (!%p183_p2), 89088  }
   0x6   : > { %186 = sbr.rel (%p183_p2) target bundleno = 791 (0x317), region = 36  ;;  %1018 = vmatprep.subr.bf16.mxu0 (!%p183_p2), %v1129_v0  ;;  %1024 = vmatprep.subr.bf16.mxu1 (!%p183_p2), %v1129_v0  ;;  %v501_v21 = vld [vmem:[%s1297_s3 + $0x8] sm:$0x7] (!%p183_p2)  ;;  %vm514_vm3 = vcmask (!%p183_p2), 83968   ;;  %vm612_vm4 = vcmask (!%p183_p2), 1044480   ;;  %vm613_vm5 = vcmask (!%p183_p2), 1045504  }
   0x7   : > { %1020 = vmatprep.mubr.msk.bf16.mxu0 (!%p183_p2), %vm1130_vm0, %v1129_v0  ;;  %1026 = vmatprep.mubr.msk.bf16.mxu1 (!%p183_p2), %vm1130_vm0, %v1129_v0  ;;  %vm850_vm6 = vcmask (!%p183_p2), 58368   ;;  %vm851_vm7 = vsmask.f32 (!%p183_p2), 1280  ;;  %vm848_vm8 = vcmask (!%p183_p2), 60416  }
   0x8   : > { %vm1263_vm9 = vmand (!%p183_p2), %vm850_vm6, %vm851_vm7 }
   0xd   : > { %s1302_s16 = smov (!%p218_p3, %s947_s16), 1 }
   0xe   : > { %s1171_s17 = sshll.u32 %s1302_s16, 5 }
   0xf   : > { %s227_s20 = scalar_lea.vmem %s1295_s1, %s1171_s17  ;;  %s222_s23 = scalar_lea.vmem %s1294_s0, %s1171_s17 }
  0x10   : > { %v1077_v1 = vld [vmem:[%s227_s20] sm:$0x3f]   ;;  %v1078_v2 = vld [vmem:[%s227_s20 + $0x8] sm:$0x3f]   ;;  %v1081_v6 = vld [vmem:[%s227_s20 + $0x10] sm:$0x3f]   ;;  %s232_s30 = scalar_lea.vmem %s1296_s2, %s1171_s17  ;;  %s1261_s7 = scalar_lea.vmem %s1298_s4, %s1171_s17 }
  0x11   : > { %v278_v3 = vsel %vm273_vm1, %v1077_v1, 0  ;;  %v335_v4 = vsel %vm273_vm1, %v1078_v2, 0  ;;  %v1079_v5 = vld [vmem:[%s222_s23] sm:$0x3f]   ;;  %v1082_v7 = vld [vmem:[%s227_s20 + $0x18] sm:$0x3f]  }
  0x12   : > { %1019 = vmatpush3.bf16.xpose.msra.mxu0 %v278_v3  ;;  %1025 = vmatpush3.bf16.xpose.msra.mxu1 %v335_v4  ;;  %v1080_v8 = vld [vmem:[%s222_s23 + $0x8] sm:$0x3f]   ;;  %v392_v9 = vsel %vm273_vm1, %v1081_v6, 0  ;;  %v449_v10 = vsel %vm273_vm1, %v1082_v7, 0  ;;  %v1083_v11 = vld [vmem:[%s222_s23 + $0x10] sm:$0x3f]  }
  0x13   : > { %1030 = vmatprep.subr.bf16.mxu0 %v1129_v0  ;;  %1036 = vmatprep.subr.bf16.mxu1 %v1129_v0  ;;  %v1084_v12 = vld [vmem:[%s222_s23 + $0x18] sm:$0x3f]  }
  0x19   : > { %1021 = vmatmul.mubr.msk.bf16.vlgmr.msra.gmra.mrb[0].mxu0 %vm273_vm1, %v1079_v5  ;;  %1027 = vmatmul.mubr.msk.bf16.vlgmr.msra.gmra.mrb[0].mxu1 %vm273_vm1, %v1080_v8 }
  0x1a   : > { %1031 = vmatpush3.bf16.xpose.msra.mxu0 %v392_v9  ;;  %1037 = vmatpush3.bf16.xpose.msra.mxu1 %v449_v10 }
  0x1b   : > { %1032 = vmatprep.mubr.msk.bf16.mxu0 %vm1130_vm0, %v1129_v0  ;;  %1038 = vmatprep.mubr.msk.bf16.mxu1 %vm1130_vm0, %v1129_v0 }
  0x1c   : > { %1042 = vmatprep.subr.bf16.mxu0 %v1129_v0  ;;  %1048 = vmatprep.subr.bf16.mxu1 %v1129_v0 }
  0x21   : > { %1033 = vmatmul.mubr.msk.bf16.vlgmr.msra.gmra.mrb[4].mxu0 %vm273_vm1, %v1083_v11  ;;  %1039 = vmatmul.mubr.msk.bf16.vlgmr.msra.gmra.mrb[4].mxu1 %vm273_vm1, %v1084_v12 }
  0x22   : > { %1044 = vmatprep.mubr.msk.bf16.mxu0 %vm1130_vm0, %v1129_v0  ;;  %1050 = vmatprep.mubr.msk.bf16.mxu1 %vm1130_vm0, %v1129_v0 }
  0xec   : > { %v314_v13 = vpop.f32.mrb[0].mxu0  ;;  %v371_v16 = vpop.f32.mrb[0].mxu1 }
  0xed   : > { %v492_v15 = vmul.f32 0.35355338, %v314_v13  ;;  %v1022_v17 = vpop.f32.mrb[1].mxu0  ;;  %v494_v18 = vmul.f32 0.35355338, %v371_v16  ;;  %v1028_v20 = vpop.f32.mrb[1].mxu1 }
  0xee   : > { %v317_v19 = vpop.f32.mrb[2].mxu0  ;;  %v374_v24 = vpop.f32.mrb[2].mxu1 }
  0xef   : > { %v493_v22 = vmul.f32 0.35355338, %v317_v19  ;;  %v1023_v23 = vpop.f32.mrb[3].mxu0  ;;  %v502_v25 = vadd.f32 %v500_v14, %v492_v15  ;;  %v495_v26 = vmul.f32 0.35355338, %v374_v24  ;;  %v1029_v27 = vpop.f32.mrb[3].mxu1  ;;  %v504_v28 = vadd.f32 %v500_v14, %v494_v18 }
  0xf1   : > { %v511_v29 = vsel %vm510_vm2, %v502_v25, -inf  ;;  %v503_v30 = vadd.f32 %v501_v21, %v493_v22  ;;  %v518_v31 = vsel %vm510_vm2, %v504_v28, -inf  ;;  %v505_v32 = vadd.f32 %v501_v21, %v495_v26 }
  0xf2   : > { %512 = vmax.xlane.f32.xlu0 %v511_v29  ;;  %519 = vmax.xlane.f32.xlu1 %v518_v31 }
  0xf3   : > { %v521_v34 = vsel %vm514_vm3, %v505_v32, -inf  ;;  %v515_v37 = vsel %vm514_vm3, %v503_v30, -inf }
  0xf4   : > { %v428_v33 = vpop.f32.mrb[4].mxu0  ;;  %v485_v38 = vpop.f32.mrb[4].mxu1 }
  0xf5   : > { %v496_v35 = vmul.f32 0.35355338, %v428_v33  ;;  %v1034_v36 = vpop.f32.mrb[5].mxu0  ;;  %v498_v40 = vmul.f32 0.35355338, %v485_v38  ;;  %v1040_v41 = vpop.f32.mrb[5].mxu1 }
  0xf6   : > { %516 = vmax.xlane.f32.xlu0 %v515_v37  ;;  %v431_v39 = vpop.f32.mrb[6].mxu0  ;;  %522 = vmax.xlane.f32.xlu1 %v521_v34  ;;  %v488_v44 = vpop.f32.mrb[6].mxu1  ;;  %v1131_v33 = vmov 65535   ;;  %v1086_v37 = vld [vmem:[%s232_s30 + $0x8] sm:$0x3f]  }
  0xf7   : > { %v497_v42 = vmul.f32 0.35355338, %v431_v39  ;;  %v1035_v43 = vpop.f32.mrb[7].mxu0  ;;  %v506_v45 = vadd.f32 %v500_v14, %v496_v35  ;;  %v499_v46 = vmul.f32 0.35355338, %v488_v44  ;;  %v1041_v47 = vpop.f32.mrb[7].mxu1  ;;  %v508_v48 = vadd.f32 %v500_v14, %v498_v40 }
  0xf8   : > { %v614_v34 = vsel %vm612_vm4, 4294967295, %v1131_v33  ;;  %v1087_v39 = vld [vmem:[%s232_s30 + $0x10] sm:$0x3f]   ;;  %v1088_v41 = vld [vmem:[%s232_s30 + $0x18] sm:$0x3f]  }
  0xf9   : > { %v524_v49 = vsel %vm510_vm2, %v506_v45, -inf  ;;  %v507_v50 = vadd.f32 %v501_v21, %v497_v42  ;;  %v509_v51 = vadd.f32 %v501_v21, %v499_v46  ;;  %v530_v53 = vsel %vm510_vm2, %v508_v48, -inf }
  0xfa   : > { %525 = vmax.xlane.f32.xlu0 %v524_v49  ;;  %v615_v35 = vsel %vm613_vm5, %v614_v34, 0 }
  0xfb   : > { %v527_v52 = vsel %vm514_vm3, %v507_v50, -inf  ;;  %v533_v54 = vsel %vm514_vm3, %v509_v51, -inf  ;;  %v669_v38 = vand.u32 %v1086_v37, %v615_v35  ;;  %v721_v40 = vand.u32 %v1087_v39, %v615_v35 }
  0xfc   : > { %528 = vmax.xlane.f32.xlu1 %v527_v52  ;;  %v773_v42 = vand.u32 %v1088_v41, %v615_v35 }
  0xfd   : > { %1049 = vmatpush3.bf16.msra.mxu1 %v669_v38 }
  0xfe   : > { %531 = vmax.xlane.f32.xlu0 %v530_v53  ;;  %1060 = vmatprep.subr.bf16.mxu1 %v1129_v0 }
 0x100   : > { %534 = vmax.xlane.f32.xlu1 %v533_v54 }
 0x17f   : > { %v513_v55 = vpop.xlane.xlu0 %512  ;;  %v520_v56 = vpop.xlane.xlu1 %519 }
 0x180   : > { %v536_v57 = vsub.f32 %v502_v25, %v513_v55  ;;  %v538_v58 = vsub.f32 %v504_v28, %v520_v56 }
 0x182   : > { %v544_v59 = vmul.f32 1.442695, %v536_v57  ;;  %v548_v60 = vmul.f32 1.442695, %v538_v58 }
 0x183   : > { %v517_v61 = vpop.xlane.xlu0 %516  ;;  %v523_v62 = vpop.xlane.xlu1 %522 }
 0x184   : > { %1089 = vpow2.f32 %v544_v59  ;;  %v537_v63 = vsub.f32 %v503_v30, %v517_v61  ;;  %v539_v1 = vsub.f32 %v505_v32, %v523_v62  ;;  %v1085_v32 = vld [vmem:[%s232_s30] sm:$0x3f]  }
 0x185   : > { %1091 = vpow2.f32 %v548_v60  ;;  %v617_v36 = vand.u32 %v1085_v32, %v615_v35 }
 0x186   : > { %v546_v2 = vmul.f32 1.442695, %v537_v63  ;;  %v550_v3 = vmul.f32 1.442695, %v539_v1 }
 0x187   : > { %v526_v4 = vpop.xlane.xlu0 %525  ;;  %1043 = vmatpush3.bf16.msra.mxu0 %v617_v36  ;;  %v865_v36 = vld [vmem:[%s1261_s7 + $0x1c] sm:$0x3] }
 0x188   : > { %1093 = vpow2.f32 %v546_v2  ;;  %v540_v5 = vsub.f32 %v506_v45, %v526_v4  ;;  %1054 = vmatprep.subr.bf16.mxu0 %v1129_v0 }
 0x189   : > { %v529_v6 = vpop.xlane.xlu1 %528  ;;  %1095 = vpow2.f32 %v550_v3 }
 0x18a   : > { %v552_v7 = vmul.f32 1.442695, %v540_v5  ;;  %v541_v8 = vsub.f32 %v507_v50, %v529_v6 }
 0x18b   : > { %v532_v9 = vpop.xlane.xlu0 %531 }
 0x18c   : > { %1097 = vpow2.f32 %v552_v7  ;;  %v554_v10 = vmul.f32 1.442695, %v541_v8  ;;  %v542_v11 = vsub.f32 %v508_v48, %v532_v9 }
 0x18d   : > { %v535_v12 = vpop.xlane.xlu1 %534 }
 0x18e   : > { %v1215_v13 = vpop.eup %1089  ;;  %1099 = vpow2.f32 %v554_v10  ;;  %v556_v14 = vmul.f32 1.442695, %v542_v11  ;;  %v543_v15 = vsub.f32 %v509_v51, %v535_v12  ;;  %v853_v12 = vld [vmem:[%s1261_s7 + $0x4] sm:$0x3] }
 0x18f   : > { %v560_v16 = vsel %vm510_vm2, %v1215_v13, 0.0  ;;  %v1219_v17 = vpop.eup %1091 }
 0x190   : > { %1101 = vpow2.f32 %v556_v14  ;;  %v558_v18 = vmul.f32 1.442695, %v543_v15  ;;  %561 = vadd.xlane.f32.xlu0 %v560_v16  ;;  %v566_v20 = vsel %vm510_vm2, %v1219_v17, 0.0 }
 0x192   : > { %v1094_v19 = vpop.eup %1093  ;;  %1103 = vpow2.f32 %v558_v18 }
 0x193   : > { %v563_v21 = vsel %vm514_vm3, %v1094_v19, 0.0  ;;  %v1096_v22 = vpop.eup %1095 }
 0x194   : > { %567 = vadd.xlane.f32.xlu0 %v566_v20  ;;  %564 = vadd.xlane.f32.xlu1 %v563_v21  ;;  %v569_v25 = vsel %vm514_vm3, %v1096_v22, 0.0  ;;  %v857_v20 = vld [vmem:[%s1261_s7 + $0xc] sm:$0x3] }
 0x196   : > { %v1224_v23 = vpop.eup %1097 }
 0x197   : > { %v572_v24 = vsel %vm510_vm2, %v1224_v23, 0.0 }
 0x198   : > { %v1100_v26 = vpop.eup %1099  ;;  %573 = vadd.xlane.f32.xlu0 %v572_v24  ;;  %570 = vadd.xlane.f32.xlu1 %v569_v25 }
 0x199   : > { %v575_v29 = vsel %vm514_vm3, %v1100_v26, 0.0 }
 0x19a   : > { %v1229_v27 = vpop.eup %1101 }
 0x19b   : > { %v578_v28 = vsel %vm510_vm2, %v1229_v27, 0.0 }
 0x19c   : > { %v1234_v30 = vpop.eup %1103  ;;  %579 = vadd.xlane.f32.xlu0 %v578_v28  ;;  %576 = vadd.xlane.f32.xlu1 %v575_v29  ;;  %v861_v28 = vld [vmem:[%s1261_s7 + $0x14] sm:$0x3] }
 0x19d   : > { %v581_v31 = vsel %vm514_vm3, %v1234_v30, 0.0 }
 0x1a0   : > { %582 = vadd.xlane.f32.xlu1 %v581_v31 }
 0x21d   : > { %v562_v43 = vpop.xlane.xlu0 %561 }
 0x21e   : > { %1105 = vrcp.f32 %v562_v43 }
 0x221   : > { %v568_v44 = vpop.xlane.xlu0 %567  ;;  %v565_v45 = vpop.xlane.xlu1 %564 }
 0x222   : > { %1107 = vrcp.f32 %v565_v45 }
 0x223   : > { %1109 = vrcp.f32 %v568_v44 }
 0x225   : > { %v574_v46 = vpop.xlane.xlu0 %573  ;;  %v571_v47 = vpop.xlane.xlu1 %570 }
 0x226   : > { %1111 = vrcp.f32 %v571_v47 }
 0x227   : > { %1113 = vrcp.f32 %v574_v46 }
 0x228   : > { %v1106_v50 = vpop.eup %1105 }
 0x229   : > { %v580_v48 = vpop.xlane.xlu0 %579  ;;  %v577_v49 = vpop.xlane.xlu1 %576  ;;  %v585_v53 = vmul.f32 %v1106_v50, %v1215_v13 }
 0x22a   : > { %1115 = vrcp.f32 %v577_v49 }
 0x22b   : > { %1117 = vrcp.f32 %v580_v48 }
 0x22c   : > { %v1108_v51 = vpop.eup %1107 }
 0x22d   : > { %v583_v52 = vpop.xlane.xlu1 %582  ;;  %v587_v54 = vmul.f32 %v1108_v51, %v1094_v19  ;;  %v1110_v55 = vpop.eup %1109 }
 0x22e   : > { %1119 = vrcp.f32 %v583_v52  ;;  %v589_v58 = vmul.f32 %v1110_v55, %v1219_v17 }
 0x22f   : > { %v600_v56 = vpack.c.bf16 %v587_v54, %v585_v53 }
 0x230   : > { %v1112_v57 = vpop.eup %1111 }
 0x231   : > { %v591_v59 = vmul.f32 %v1112_v57, %v1096_v22  ;;  %1045 = vmatmul.mubr.msk.bf16.vlgmr.msra.gmra.mrb[8].mxu0 %vm510_vm2, %v600_v56  ;;  %v1114_v60 = vpop.eup %1113 }
 0x232   : > { %1055 = vmatpush3.bf16.msra.mxu0 %v721_v40  ;;  %1056 = vmatprep.mubr.msk.bf16.mxu0 %vm1130_vm0, %v1129_v0  ;;  %v593_v1 = vmul.f32 %v1114_v60, %v1224_v23 }
 0x233   : > { %v601_v61 = vpack.c.bf16 %v591_v59, %v589_v58 }
 0x234   : > { %v1116_v62 = vpop.eup %1115 }
 0x235   : > { %v1118_v63 = vpop.eup %1117  ;;  %v595_v2 = vmul.f32 %v1116_v62, %v1100_v26  ;;  %1051 = vmatmul.mubr.msk.bf16.vlgmr.msra.gmra.mrb[8].mxu1 %vm510_vm2, %v601_v61 }
 0x236   : > { %1061 = vmatpush3.bf16.msra.mxu1 %v773_v42  ;;  %1062 = vmatprep.mubr.msk.bf16.mxu1 %vm1130_vm0, %v1129_v0  ;;  %v597_v5 = vmul.f32 %v1118_v63, %v1229_v27 }
 0x237   : > { %v602_v4 = vpack.c.bf16 %v595_v2, %v593_v1 }
 0x238   : > { %v1120_v3 = vpop.eup %1119 }
 0x239   : > { %v599_v6 = vmul.f32 %v1120_v3, %v1234_v30  ;;  %1057 = vmatmul.mubr.msk.bf16.vlgmr.msra.gmra.mrb[12].mxu0 %vm510_vm2, %v602_v4 }
 0x23b   : > { %v603_v7 = vpack.c.bf16 %v599_v6, %v597_v5 }
 0x23d   : > { %1063 = vmatmul.mubr.msk.bf16.vlgmr.msra.gmra.mrb[12].mxu1 %vm510_vm2, %v603_v7 }
 0x304   : > { %v653_v0 = vpop.f32.mrb[8].mxu0 }
 0x305   : > { %v994_v8 = vpack.c.bf16 %v653_v0, %v653_v0  ;;  %v1046_v9 = vpop.f32.mrb[9].mxu0 }
 0x306   : > { %v656_v10 = vpop.f32.mrb[10].mxu0 }
 0x307   : > { %849 = vst.msk [vmem:[%s1261_s7] sm:$0xf] %vm848_vm8, %v994_v8  ;;  %v995_v13 = vpack.c.bf16 %v656_v10, %v656_v10  ;;  %v1047_v14 = vpop.f32.mrb[11].mxu0 }
 0x308   : > { %v705_v15 = vpop.f32.mrb[8].mxu1 }
 0x309   : > { %v854_v16 = vsel %vm1263_vm9, %v995_v13, %v853_v12  ;;  %v996_v17 = vpack.c.bf16 %v705_v15, %v705_v15  ;;  %v1052_v18 = vpop.f32.mrb[9].mxu1 }
 0x30a   : > { %855 = vst [vmem:[%s1261_s7 + $0x4] sm:$0x3] %v854_v16  ;;  %v708_v19 = vpop.f32.mrb[10].mxu1 }
 0x30b   : > { %856 = vst.msk [vmem:[%s1261_s7 + $0x8] sm:$0xf] %vm848_vm8, %v996_v17  ;;  %v997_v21 = vpack.c.bf16 %v708_v19, %v708_v19  ;;  %v1053_v22 = vpop.f32.mrb[11].mxu1 }
 0x30c   : > { %v757_v23 = vpop.f32.mrb[12].mxu0 }
 0x30d   : > { %v858_v24 = vsel %vm1263_vm9, %v997_v21, %v857_v20  ;;  %v998_v25 = vpack.c.bf16 %v757_v23, %v757_v23  ;;  %v1058_v26 = vpop.f32.mrb[13].mxu0 }
 0x30e   : > { %859 = vst [vmem:[%s1261_s7 + $0xc] sm:$0x3] %v858_v24  ;;  %v760_v27 = vpop.f32.mrb[14].mxu0 }
 0x30f   : > { %860 = vst.msk [vmem:[%s1261_s7 + $0x10] sm:$0xf] %vm848_vm8, %v998_v25  ;;  %v999_v29 = vpack.c.bf16 %v760_v27, %v760_v27  ;;  %v1059_v30 = vpop.f32.mrb[15].mxu0 }
 0x310   : > { %v809_v31 = vpop.f32.mrb[12].mxu1 }
 0x311   : > { %v862_v32 = vsel %vm1263_vm9, %v999_v29, %v861_v28  ;;  %v1000_v33 = vpack.c.bf16 %v809_v31, %v809_v31  ;;  %v1064_v34 = vpop.f32.mrb[13].mxu1 }
 0x312   : > { %863 = vst [vmem:[%s1261_s7 + $0x14] sm:$0x3] %v862_v32  ;;  %v812_v35 = vpop.f32.mrb[14].mxu1 }
 0x313   : > { %864 = vst.msk [vmem:[%s1261_s7 + $0x18] sm:$0xf] %vm848_vm8, %v1000_v33  ;;  %v1001_v37 = vpack.c.bf16 %v812_v35, %v812_v35  ;;  %v1065_v38 = vpop.f32.mrb[15].mxu1 }
 0x315   : > { %v866_v39 = vsel %vm1263_vm9, %v1001_v37, %v865_v36 }
 0x316   : > { %867 = vst [vmem:[%s1261_s7 + $0x1c] sm:$0x3] %v866_v39 }
 0x317 PF: > { %s14_s15 = sadd.s32 1, %s1127_s15  }
 0x318   : > { %p11_p4 = scmp.ge.s32.totalorder %s14_s15, 4  }
 0x31a   :  { %13 = sbr.rel (!%p11_p4) target bundleno = 1 (0x1), region = 72 }

// kernel: _lambda_.45
= control target key start
LH: loop header
LB: loop body
LE: loop exit
PB: predicated region body
PF: predicated region fallthrough
CT: control target
= control target key end

     0   :  { %vm20_vm0 = vcmask 261120   ;;  %s230_s0 = inlined_call_operand.vmem [shape: f32[16,32], index: 0, kind: input, shape index: {}]   ;;  %s231_s1 = inlined_call_operand.vmem [shape: f32[1,32], index: 1, kind: input, shape index: {}]   ;;  %s232_s2 = inlined_call_operand.vmem [shape: bf16[32,64], index: 2, kind: input, shape index: {}]   ;;  %s233_s3 = inlined_call_operand.hbm [shape: f32[16,64], index: 3, kind: output, shape index: {}]  }
   0x1   :  { %v16_v0 = vld [vmem:[%s230_s0] sm:$0xff]  ;;  %v17_v1 = vld [vmem:[%s230_s0 + $0x8] sm:$0xff] }
   0x2   :  { %v18_v2 = vmul.f32 %v16_v0, %v16_v0  ;;  %v19_v3 = vmul.f32 %v17_v1, %v17_v1 }
   0x3   :  { %8 = vsyncpa [#allocation3], 0  ;;  %v145_v6 = vld [vmem:[%s232_s2] sm:$0xff]   ;;  %v175_v7 = vmov 0.0   ;;  %vm176_vm1 = vmmov 0   ;;  %v146_v8 = vld [vmem:[%s232_s2 + $0x8] sm:$0xff]  }
   0x4   :  { %v21_v4 = vsel %vm20_vm0, %v18_v2, 0.0  ;;  %v24_v5 = vsel %vm20_vm0, %v19_v3, 0.0  ;;  %132 = vmatprep.subr.bf16.mxu0 %v175_v7  ;;  %136 = vmatprep.mubr.msk.bf16.mxu0 %vm176_vm1, %v175_v7  ;;  %v125_v18 = vld [vmem:[%s231_s1] ss:$0 sm:$0xff]  ;;  %s177_s2 = smov [#allocation2]   ;;  %vm106_vm2 = vcmask 523264  }
   0x5   :  { %22 = vadd.xlane.f32.xlu0 %v21_v4  ;;  %133 = vmatpush3.bf16.msra.mxu0 %v145_v6  ;;  %s114_s21 = sshll.u32 %s177_s2, 4  ;;  %s115_s21 = int_to_ptr.vmem [resolvable:$true] %s114_s21 }
   0x6   :  { %134 = vmatprep.subr.bf16.mxu0 %v175_v7  ;;  %s151_s22 = scalar_lea.vmem %s115_s21, 256  ;;  %p156_p1 = scmp.lt.s32.totalorder %s115_s21, %s115_s21 }
   0x7   :  { %p152_p0 = scmp.ne.s32.totalorder %s115_s21, %s151_s22  ;;  %p157_p2 = scmp.lt.s32.totalorder %s151_s22, %s151_s22 }
   0x9   :  { %25 = vadd.xlane.f32.xlu0 %v24_v5  ;;  %135 = vmatpush3.bf16.msra.mxu0 %v146_v8  ;;  %p158_p3 = por %p157_p2, %p156_p1 }
   0xb   :  { %p159_p4 = pnand %p158_p3, %p152_p0 }
  0x92   :  { %v23_v9 = vpop.xlane.xlu0 %22 }
  0x93   :  { %v28_v10 = vmul.f32 0.03125, %v23_v9 }
  0x95   :  { %v30_v11 = vadd.f32 1e-05, %v28_v10 }
  0x96   :  { %v26_v12 = vpop.xlane.xlu0 %25 }
  0x97   :  { %147 = vrsqrt.f32 %v30_v11  ;;  %v29_v13 = vmul.f32 0.03125, %v26_v12 }
  0x99   :  { %v31_v14 = vadd.f32 1e-05, %v29_v13 }
  0x9b   :  { %149 = vrsqrt.f32 %v31_v14 }
  0xa1   :  { %v148_v15 = vpop.eup %147 }
  0xa2   :  { %v34_v16 = vmul.f32 %v148_v15, %v16_v0 }
  0xa4   :  { %v43_v20 = vmul.f32 %v125_v18, %v34_v16 }
  0xa5   :  { %v150_v17 = vpop.eup %149 }
  0xa6   :  { %v35_v19 = vmul.f32 %v150_v17, %v17_v1 }
  0xa8   :  { %v44_v21 = vmul.f32 %v125_v18, %v35_v19 }
  0xaa   :  { %v45_v22 = vpack.c.bf16 %v44_v21, %v43_v20 }
  0xac   :  { %137 = vmatmul.mubr.msk.bf16.vlgmr.msra.gmra.mrb[0].mxu0 %vm20_vm0, %v45_v22 }
 0x17f   :  { %v99_v23 = vpop.f32.mrb[0].mxu0 }
 0x180   :  { %107 = vst.msk [vmem:[#allocation2] sm:$0xff] %vm106_vm2, %v99_v23  ;;  %v138_v24 = vpop.f32.mrb[1].mxu0 }
 0x181   :  { %v102_v25 = vpop.f32.mrb[2].mxu0 }
 0x182   :  { %108 = vst.msk [vmem:[#allocation2 + $0x8] sm:$0xff] %vm106_vm2, %v102_v25  ;;  %v139_v26 = vpop.f32.mrb[3].mxu0 }
 0x183   :  { %162 = shalt.err (!%p159_p4)
}
 0x184   :  { %s163_s24 = scalar_lea.hbm %s233_s3, 256 }
 0x185   :  { %p164_p5 = scmp.ne.s32.totalorder %s233_s3, %s163_s24  ;;  %p167_p6 = scmp.lt.u32.totalorder %s163_s24, %s233_s3 }
 0x187   :  { %p169_p7 = pnand %p167_p6, %p164_p5 }
 0x189   :  { %172 = shalt.err (!%p169_p7)
}
 0x18a   :  { %s178_s29 = smov 128   ;;  %s179_s30 = smov 8  }
 0x18b   :  { %120 = dma.vmem_to_hbm [thread:$0]  %s115_s21, 256, %s233_s3, [#allocation3], %s178_s29, %s178_s29, %s179_s30  }
 0x18c   :  { %173 = dma.done.wait [#allocation3], 256  }
 0x18d   :  { %174 = vsyncadd [#allocation3], 4294967040 }
 0x18e   :  { %124 = vsyncpa [#allocation3], 1 }

</bundles_post_ra>
